<compile_context>
chip_gen: v7x
topology: tpu7x:2x2x1
jax: 0.10.0
libtpu: 0.0.40
codegen_flags: <defaults>
</compile_context>

<pallas_src>
import functools

import jax
import jax.numpy as jnp
import numpy as np
from jax import lax
from jax.experimental import pallas as pl
from jax.experimental.pallas import tpu as pltpu


# -----------------------------------------------------------------------------
# Tiling helpers
# -----------------------------------------------------------------------------
def _choose_time_block(T, cap=32):
    """Largest divisor of T not exceeding cap (timesteps per grid step)."""
    for tt in range(min(T, cap), 0, -1):
        if T % tt == 0:
            return tt
    return 1


def _choose_batch_block(B):
    """Split batch across v7x's two TensorCores only when halves stay sublane-aligned."""
    if B % 16 == 0:
        return B // 2
    return B


def _choose_row_block(R, cap=512):
    """Row-block for the hoisted input projection matmul."""
    if R <= cap:
        return R
    for rb in range(cap - cap % 8, 0, -8):
        if R % rb == 0:
            return rb
    return R


# -----------------------------------------------------------------------------
# Kernel 1: hoisted input projection  gi[t,b,:] = x[t,b,:] @ Wih + b_folded
# One big (T*B, I) x (I, 3H) matmul instead of 3*T tiny matmuls on the serial path.
# -----------------------------------------------------------------------------
def input_proj_kernel(x_ref, w_ref, b_ref, gi_ref):
    gi = jnp.dot(x_ref[...], w_ref[...], preferred_element_type=jnp.float32)
    gi_ref[...] = (gi + b_ref[...]).astype(gi_ref.dtype)


def input_projection(x, wih, b_in):
    """x: (T, B, I) -> gi: (T, B, 3H) with folded biases already added."""
    T, B, I = x.shape
    G = wih.shape[1]
    R = T * B
    Rb = _choose_row_block(R)
    x2 = x.reshape(R, I)
    gi = pl.pallas_call(
        input_proj_kernel,
        out_shape=jax.ShapeDtypeStruct((R, G), x.dtype),
        grid_spec=pltpu.PrefetchScalarGridSpec(
            num_scalar_prefetch=0,
            grid=(R // Rb,),
            in_specs=[
                pl.BlockSpec((Rb, I), lambda r: (r, 0)),
                pl.BlockSpec((I, G), lambda r: (0, 0)),
                pl.BlockSpec((1, G), lambda r: (0, 0)),
            ],
            out_specs=pl.BlockSpec((Rb, G), lambda r: (r, 0)),
        ),
        compiler_params=pltpu.CompilerParams(dimension_semantics=("parallel",)),
    )(x2, wih, b_in)
    return gi.reshape(T, B, G)


# -----------------------------------------------------------------------------
# Shared recurrent inner loop (Tt timesteps inside one grid step).
# gi_ref: (Tt, Bb, 3H) precomputed input projection (biases folded in)
# whh_ref: (H, 3H) fused hidden weights (bf16), b_hn: (1, H) f32
# h0: (Bb, H) f32 carry.  Optionally writes per-step hidden states to hseq_ref.
# -----------------------------------------------------------------------------
def _gru_timesteps(gi_ref, whh_ref, b_hn, h0, hseq_ref=None):
    Tt = gi_ref.shape[0]
    H = whh_ref.shape[0]

    def step(t, h_prev):
        # Single fused (Bb, H) @ (H, 3H) matmul per serial step (bf16 in, f32 acc).
        gh = jnp.dot(h_prev.astype(whh_ref.dtype), whh_ref[...],
                     preferred_element_type=jnp.float32)        # (Bb, 3H) f32
        gi_t = gi_ref[t].astype(jnp.float32)                     # (Bb, 3H) f32
        # Elementwise gate math kept in f32 (v5e VPU/EUP have no bf16 path).
        r = jax.nn.sigmoid(gi_t[:, :H] + gh[:, :H])
        z = jax.nn.sigmoid(gi_t[:, H:2 * H] + gh[:, H:2 * H])
        n = jnp.tanh(gi_t[:, 2 * H:] + r * (gh[:, 2 * H:] + b_hn))
        h_new = (1.0 - z) * n + z * h_prev
        if hseq_ref is not None:
            hseq_ref[t] = h_new.astype(hseq_ref.dtype)
        return h_new

    return lax.fori_loop(0, Tt, step, h0, unroll=True)


# -----------------------------------------------------------------------------
# Kernel 2: intermediate GRU layer (emits the full hidden-state sequence, bf16).
# grid = (batch blocks "parallel", time blocks "arbitrary"); h carried in VMEM.
# -----------------------------------------------------------------------------
def gru_seq_kernel(gi_ref, whh_ref, bhn_ref, hseq_ref, h_sc):
    tb = pl.program_id(1)

    @pl.when(tb == 0)
    def _init():
        h_sc[...] = jnp.zeros(h_sc.shape, h_sc.dtype)

    b_hn = bhn_ref[...].astype(jnp.float32)
    h_final = _gru_timesteps(gi_ref, whh_ref, b_hn, h_sc[...], hseq_ref)
    h_sc[...] = h_final


def gru_layer_hidden_seq(gi, whh, b_hn):
    T, B, G = gi.shape
    H = whh.shape[0]
    Tt = _choose_time_block(T)
    Bb = _choose_batch_block(B)
    return pl.pallas_call(
        gru_seq_kernel,
        out_shape=jax.ShapeDtypeStruct((T, B, H), whh.dtype),
        grid_spec=pltpu.PrefetchScalarGridSpec(
            num_scalar_prefetch=0,
            grid=(B // Bb, T // Tt),
            in_specs=[
                pl.BlockSpec((Tt, Bb, G), lambda b, t: (t, b, 0)),
                # Constant-index weight blocks: Pallas skips re-DMA across steps.
                pl.BlockSpec((H, G), lambda b, t: (0, 0)),
                pl.BlockSpec((1, H), lambda b, t: (0, 0)),
            ],
            out_specs=pl.BlockSpec((Tt, Bb, H), lambda b, t: (t, b, 0)),
            scratch_shapes=[pltpu.VMEM((Bb, H), jnp.float32)],
        ),
        compiler_params=pltpu.CompilerParams(
            dimension_semantics=("parallel", "arbitrary")),
    )(gi, whh, b_hn)


# -----------------------------------------------------------------------------
# Kernel 3: LAST GRU layer fused with the MLP classifier.
# Never writes the (T, B, H) sequence; only the (B, C) logits on the final step.
# -----------------------------------------------------------------------------
def gru_last_mlp_kernel(gi_ref, whh_ref, bhn_ref, w1_ref, b1_ref, w2_ref, b2_ref,
                        out_ref, h_sc):
    tb = pl.program_id(1)
    n_tb = pl.num_programs(1)

    @pl.when(tb == 0)
    def _init():
        h_sc[...] = jnp.zeros(h_sc.shape, h_sc.dtype)

    b_hn = bhn_ref[...].astype(jnp.float32)
    h_final = _gru_timesteps(gi_ref, whh_ref, b_hn, h_sc[...], None)
    h_sc[...] = h_final

    @pl.when(tb == n_tb - 1)
    def _classify():
        z1 = jnp.dot(h_final.astype(w1_ref.dtype), w1_ref[...],
                     preferred_element_type=jnp.float32) + b1_ref[...]
        a1 = jnp.maximum(z1, 0.0)
        z2 = jnp.dot(a1.astype(w2_ref.dtype), w2_ref[...],
                     preferred_element_type=jnp.float32) + b2_ref[...]
        out_ref[...] = z2.astype(out_ref.dtype)


def gru_last_layer_logits(gi, whh, b_hn, w1, b1, w2, b2):
    T, B, G = gi.shape
    H = whh.shape[0]
    Hm = w1.shape[1]
    C = w2.shape[1]
    Tt = _choose_time_block(T)
    Bb = _choose_batch_block(B)
    return pl.pallas_call(
        gru_last_mlp_kernel,
        out_shape=jax.ShapeDtypeStruct((B, C), jnp.float32),
        grid_spec=pltpu.PrefetchScalarGridSpec(
            num_scalar_prefetch=0,
            grid=(B // Bb, T // Tt),
            in_specs=[
                pl.BlockSpec((Tt, Bb, G), lambda b, t: (t, b, 0)),
                pl.BlockSpec((H, G), lambda b, t: (0, 0)),
                pl.BlockSpec((1, H), lambda b, t: (0, 0)),
                pl.BlockSpec((H, Hm), lambda b, t: (0, 0)),
                pl.BlockSpec((1, Hm), lambda b, t: (0, 0)),
                pl.BlockSpec((Hm, C), lambda b, t: (0, 0)),
                pl.BlockSpec((1, C), lambda b, t: (0, 0)),
            ],
            out_specs=pl.BlockSpec((Bb, C), lambda b, t: (b, 0)),
            scratch_shapes=[pltpu.VMEM((Bb, H), jnp.float32)],
        ),
        compiler_params=pltpu.CompilerParams(
            dimension_semantics=("parallel", "arbitrary")),
    )(gi, whh, b_hn, w1, b1, w2, b2)


# -----------------------------------------------------------------------------
# Full GRU_Model forward.
# -----------------------------------------------------------------------------
@jax.jit
def gru_model_forward(x, params):
    compute_dtype = params["gru"][0]["wih"].dtype
    h_in = x.astype(compute_dtype)

    # Intermediate layers: hoisted input projection + recurrent kernel emitting hseq.
    for layer in params["gru"][:-1]:
        gi = input_projection(h_in, layer["wih"], layer["b_in"])
        h_in = gru_layer_hidden_seq(gi, layer["whh"], layer["b_hn"])

    # Last layer: recurrence + fused MLP classifier, logits only.
    last = params["gru"][-1]
    gi = input_projection(h_in, last["wih"], last["b_in"])
    mlp = params["mlp"]
    return gru_last_layer_logits(gi, last["whh"], last["b_hn"],
                                 mlp["w1"], mlp["b1"], mlp["w2"], mlp["b2"])


# -----------------------------------------------------------------------------
# Pure-JAX reference (PyTorch GRU equations) using the same (fused) parameters.
# -----------------------------------------------------------------------------
def gru_model_reference(x, params):
    h_in = x.astype(jnp.float32)
    for layer in params["gru"]:
        wih = layer["wih"].astype(jnp.float32)     # (in, 3H)
        whh = layer["whh"].astype(jnp.float32)     # (H, 3H)
        b_in = layer["b_in"]                       # (1, 3H) f32 (r/z parts pre-summed)
        b_hn = layer["b_hn"]                       # (1, H)  f32
        H = whh.shape[0]

        def step(h, x_t):
            gi = x_t @ wih + b_in
            gh = h @ whh
            r = jax.nn.sigmoid(gi[:, :H] + gh[:, :H])
            z = jax.nn.sigmoid(gi[:, H:2 * H] + gh[:, H:2 * H])
            n = jnp.tanh(gi[:, 2 * H:] + r * (gh[:, 2 * H:] + b_hn))
            h_new = (1.0 - z) * n + z * h
            return h_new, h_new

        h0 = jnp.zeros((x.shape[1], H), jnp.float32)
        _, h_in = lax.scan(step, h0, h_in)

    final_hidden = h_in[-1]
    mlp = params["mlp"]
    a1 = jnp.maximum(final_hidden @ mlp["w1"].astype(jnp.float32) + mlp["b1"], 0.0)
    return a1 @ mlp["w2"].astype(jnp.float32) + mlp["b2"]


# -----------------------------------------------------------------------------
# Parameter init: PyTorch-style uniform(-1/sqrt(H), 1/sqrt(H)), then fused/folded.
# Weights stored in bf16 (MXU operands); biases stay f32.
# -----------------------------------------------------------------------------
def init_params(key, input_size, hidden_size, num_layers, num_classes, mlp_hidden,
                compute_dtype=jnp.bfloat16):
    H = hidden_size
    bound = 1.0 / np.sqrt(H)
    params = {"gru": [], "mlp": {}}
    for layer in range(num_layers):
        in_dim = input_size if layer == 0 else H
        key, k1, k2, k3, k4 = jax.random.split(key, 5)
        # PyTorch layout: weight_ih (3H, in), weight_hh (3H, H), biases (3H,);
        # row blocks stacked in gate order (r, z, n).
        w_ih = jax.random.uniform(k1, (3 * H, in_dim), jnp.float32, -bound, bound)
        w_hh = jax.random.uniform(k2, (3 * H, H), jnp.float32, -bound, bound)
        b_ih = jax.random.uniform(k3, (3 * H,), jnp.float32, -bound, bound)
        b_hh = jax.random.uniform(k4, (3 * H,), jnp.float32, -bound, bound)
        # Fused: columns [r | z | n]; fold b_ih+b_hh for r/z and b_ih for n into b_in,
        # keep b_hh_n separate (it is gated by r).
        b_fold = jnp.concatenate(
            [b_ih[:H] + b_hh[:H], b_ih[H:2 * H] + b_hh[H:2 * H], b_ih[2 * H:]]
        ).reshape(1, 3 * H)
        params["gru"].append({
            "wih": jnp.transpose(w_ih).astype(compute_dtype),   # (in, 3H)
            "whh": jnp.transpose(w_hh).astype(compute_dtype),   # (H, 3H)
            "b_in": b_fold,                                     # (1, 3H) f32
            "b_hn": b_hh[2 * H:].reshape(1, H),                 # (1, H)  f32
        })

    key, k1, k2, k3, k4 = jax.random.split(key, 5)
    b1 = 1.0 / np.sqrt(hidden_size)
    b2 = 1.0 / np.sqrt(mlp_hidden)
    params["mlp"] = {
        "w1": jax.random.uniform(k1, (hidden_size, mlp_hidden), jnp.float32, -b1, b1
                                 ).astype(compute_dtype),
        "b1": jax.random.uniform(k2, (1, mlp_hidden), jnp.float32, -b1, b1),
        "w2": jax.random.uniform(k3, (mlp_hidden, num_classes), jnp.float32, -b2, b2
                                 ).astype(compute_dtype),
        "b2": jax.random.uniform(k4, (1, num_classes), jnp.float32, -b2, b2),
    }
    return params


if __name__ == "__main__":
    # x is time-major (seq_len, batch, input_size) like nn.GRU's default layout.
    SEQ, BATCH, INPUT, HIDDEN = 8, 4, 16, 32
    LAYERS, CLASSES, MLP_HIDDEN = 2, 3, 32

    key = jax.random.PRNGKey(0)
    key, kx = jax.random.split(key)
    x = jax.random.normal(kx, (SEQ, BATCH, INPUT), jnp.float32)
    params = init_params(key, INPUT, HIDDEN, LAYERS, CLASSES, MLP_HIDDEN)

    # Feed the same bf16-rounded activations to kernel and reference so the only
    # difference is intermediate bf16 rounding inside the kernels.
    x_in = x.astype(jnp.bfloat16)

    logits = gru_model_forward(x_in, params)
    logits = jax.block_until_ready(logits)
    assert logits.shape == (BATCH, CLASSES)

    ref = gru_model_reference(x_in, params)
    np.testing.assert_allclose(np.asarray(logits, dtype=np.float32),
                               np.asarray(ref, dtype=np.float32),
                               rtol=2e-2, atol=2e-2)
    print("KERNEL_OK")
</pallas_src>

<mosaic_0001>
module attributes {stable_mosaic.version = 11 : i64} {
  func.func @input_proj_kernel(%arg0: i32, %arg1: memref<32x32xbf16, #tpu.memory_space<vmem>>, %arg2: memref<32x96xbf16, #tpu.memory_space<vmem>>, %arg3: memref<1x96xf32, #tpu.memory_space<vmem>>, %arg4: memref<32x96xbf16, #tpu.memory_space<vmem>>) attributes {dimension_semantics = [#tpu.dimension_semantics<parallel>], iteration_bounds = array<i64: 1>, scalar_prefetch = 0 : i64, scratch_operands = 0 : i64, tpu.core_type = #tpu.core_type<tc>, window_params = [{transform_indices = @transform_0, window_bounds = array<i64: 32, 32>}, {pipeline_mode = #tpu.pipeline_mode<synchronous>, transform_indices = @transform_1, window_bounds = array<i64: 32, 96>}, {pipeline_mode = #tpu.pipeline_mode<synchronous>, transform_indices = @transform_2, window_bounds = array<i64: 1, 96>}, {transform_indices = @transform_3, window_bounds = array<i64: 32, 96>}]} {
    %c0 = arith.constant 0 : index
    %c0_0 = arith.constant 0 : index
    %0 = vector.load %arg1[%c0, %c0_0] : memref<32x32xbf16, #tpu.memory_space<vmem>>, vector<32x32xbf16>
    %c0_1 = arith.constant 0 : index
    %c0_2 = arith.constant 0 : index
    %1 = vector.load %arg2[%c0_1, %c0_2] : memref<32x96xbf16, #tpu.memory_space<vmem>>, vector<32x96xbf16>
    %cst = arith.constant dense<0.000000e+00> : vector<32x96xf32>
    %2 = tpu.matmul %0, %1, %cst {dimension_numbers = #tpu.dot_dimension_numbers<[1], [0], [0], [1], [0, 0, 1, 1], [], []>} : vector<32x32xbf16>, vector<32x96xbf16>, vector<32x96xf32> -> vector<32x96xf32>
    %c0_3 = arith.constant 0 : index
    %c0_4 = arith.constant 0 : index
    %3 = vector.load %arg3[%c0_3, %c0_4] : memref<1x96xf32, #tpu.memory_space<vmem>>, vector<1x96xf32>
    %4 = vector.broadcast %3 : vector<1x96xf32> to vector<32x96xf32>
    %5 = arith.addf %2, %4 : vector<32x96xf32>
    %6 = arith.truncf %5 : vector<32x96xf32> to vector<32x96xbf16>
    %c0_5 = arith.constant 0 : index
    %c0_6 = arith.constant 0 : index
    %7 = vector.load %arg4[%c0_5, %c0_6] : memref<32x96xbf16, #tpu.memory_space<vmem>>, vector<32x96xbf16>
    tpu.vector_store %arg4[%c0_5, %c0_6], %6 {strides = array<i32>} : memref<32x96xbf16, #tpu.memory_space<vmem>>, vector<32x96xbf16>,
    return
  }
  func.func @transform_0(%arg0: i32) -> (i32, i32) {
    %c0_i32 = arith.constant 0 : i32
    %c0_i32_0 = arith.constant 0 : i32
    return %arg0, %c0_i32 : i32, i32
  }
  func.func @transform_1(%arg0: i32) -> (i32, i32) {
    %c0_i32 = arith.constant 0 : i32
    %c0_i32_0 = arith.constant 0 : i32
    %c0_i32_1 = arith.constant 0 : i32
    return %c0_i32, %c0_i32_0 : i32, i32
  }
  func.func @transform_2(%arg0: i32) -> (i32, i32) {
    %c0_i32 = arith.constant 0 : i32
    %c0_i32_0 = arith.constant 0 : i32
    %c0_i32_1 = arith.constant 0 : i32
    return %c0_i32, %c0_i32_0 : i32, i32
  }
  func.func @transform_3(%arg0: i32) -> (i32, i32) {
    %c0_i32 = arith.constant 0 : i32
    %c0_i32_0 = arith.constant 0 : i32
    return %arg0, %c0_i32 : i32, i32
  }
}

module attributes {stable_mosaic.version = 11 : i64} {
  func.func @input_proj_kernel(%arg0: i32, %arg1: memref<32x16xbf16, #tpu.memory_space<vmem>>, %arg2: memref<16x96xbf16, #tpu.memory_space<vmem>>, %arg3: memref<1x96xf32, #tpu.memory_space<vmem>>, %arg4: memref<32x96xbf16, #tpu.memory_space<vmem>>) attributes {dimension_semantics = [#tpu.dimension_semantics<parallel>], iteration_bounds = array<i64: 1>, scalar_prefetch = 0 : i64, scratch_operands = 0 : i64, tpu.core_type = #tpu.core_type<tc>, window_params = [{transform_indices = @transform_0, window_bounds = array<i64: 32, 16>}, {pipeline_mode = #tpu.pipeline_mode<synchronous>, transform_indices = @transform_1, window_bounds = array<i64: 16, 96>}, {pipeline_mode = #tpu.pipeline_mode<synchronous>, transform_indices = @transform_2, window_bounds = array<i64: 1, 96>}, {transform_indices = @transform_3, window_bounds = array<i64: 32, 96>}]} {
    %c0 = arith.constant 0 : index
    %c0_0 = arith.constant 0 : index
    %0 = vector.load %arg1[%c0, %c0_0] : memref<32x16xbf16, #tpu.memory_space<vmem>>, vector<32x16xbf16>
    %c0_1 = arith.constant 0 : index
    %c0_2 = arith.constant 0 : index
    %1 = vector.load %arg2[%c0_1, %c0_2] : memref<16x96xbf16, #tpu.memory_space<vmem>>, vector<16x96xbf16>
    %cst = arith.constant dense<0.000000e+00> : vector<32x96xf32>
    %2 = tpu.matmul %0, %1, %cst {dimension_numbers = #tpu.dot_dimension_numbers<[1], [0], [0], [1], [0, 0, 1, 1], [], []>} : vector<32x16xbf16>, vector<16x96xbf16>, vector<32x96xf32> -> vector<32x96xf32>
    %c0_3 = arith.constant 0 : index
    %c0_4 = arith.constant 0 : index
    %3 = vector.load %arg3[%c0_3, %c0_4] : memref<1x96xf32, #tpu.memory_space<vmem>>, vector<1x96xf32>
    %4 = vector.broadcast %3 : vector<1x96xf32> to vector<32x96xf32>
    %5 = arith.addf %2, %4 : vector<32x96xf32>
    %6 = arith.truncf %5 : vector<32x96xf32> to vector<32x96xbf16>
    %c0_5 = arith.constant 0 : index
    %c0_6 = arith.constant 0 : index
    %7 = vector.load %arg4[%c0_5, %c0_6] : memref<32x96xbf16, #tpu.memory_space<vmem>>, vector<32x96xbf16>
    tpu.vector_store %arg4[%c0_5, %c0_6], %6 {strides = array<i32>} : memref<32x96xbf16, #tpu.memory_space<vmem>>, vector<32x96xbf16>,
    return
  }
  func.func @transform_0(%arg0: i32) -> (i32, i32) {
    %c0_i32 = arith.constant 0 : i32
    %c0_i32_0 = arith.constant 0 : i32
    return %arg0, %c0_i32 : i32, i32
  }
  func.func @transform_1(%arg0: i32) -> (i32, i32) {
    %c0_i32 = arith.constant 0 : i32
    %c0_i32_0 = arith.constant 0 : i32
    %c0_i32_1 = arith.constant 0 : i32
    return %c0_i32, %c0_i32_0 : i32, i32
  }
  func.func @transform_2(%arg0: i32) -> (i32, i32) {
    %c0_i32 = arith.constant 0 : i32
    %c0_i32_0 = arith.constant 0 : i32
    %c0_i32_1 = arith.constant 0 : i32
    return %c0_i32, %c0_i32_0 : i32, i32
  }
  func.func @transform_3(%arg0: i32) -> (i32, i32) {
    %c0_i32 = arith.constant 0 : i32
    %c0_i32_0 = arith.constant 0 : i32
    return %arg0, %c0_i32 : i32, i32
  }
}

module attributes {stable_mosaic.version = 11 : i64} {
  func.func @gru_seq_kernel(%arg0: i32, %arg1: i32, %arg2: memref<8x4x96xbf16, #tpu.memory_space<vmem>>, %arg3: memref<32x96xbf16, #tpu.memory_space<vmem>>, %arg4: memref<1x32xf32, #tpu.memory_space<vmem>>, %arg5: memref<8x4x32xbf16, #tpu.memory_space<vmem>>, %arg6: memref<4x32xf32, #tpu.memory_space<vmem>>) attributes {dimension_semantics = [#tpu.dimension_semantics<parallel>, #tpu.dimension_semantics<arbitrary>], iteration_bounds = array<i64: 1, 1>, scalar_prefetch = 0 : i64, scratch_operands = 1 : i64, tpu.core_type = #tpu.core_type<tc>, window_params = [{transform_indices = @transform_0, window_bounds = array<i64: 8, 4, 96>}, {pipeline_mode = #tpu.pipeline_mode<synchronous>, transform_indices = @transform_1, window_bounds = array<i64: 32, 96>}, {pipeline_mode = #tpu.pipeline_mode<synchronous>, transform_indices = @transform_2, window_bounds = array<i64: 1, 32>}, {transform_indices = @transform_3, window_bounds = array<i64: 8, 4, 32>}]} {
    %c0_i32 = arith.constant 0 : i32
    %0 = arith.cmpi eq, %arg1, %c0_i32 : i32
    %1 = arith.extui %0 : i1 to i32
    %c0_i32_0 = arith.constant 0 : i32
    %2 = arith.cmpi ne, %1, %c0_i32_0 : i32
    scf.if %2 {
      %cst_86 = arith.constant 0.000000e+00 : f32
      %326 = vector.broadcast %cst_86 : f32 to vector<4x32xf32>
      %c0_87 = arith.constant 0 : index
      %c0_88 = arith.constant 0 : index
      %327 = vector.load %arg6[%c0_87, %c0_88] : memref<4x32xf32, #tpu.memory_space<vmem>>, vector<4x32xf32>
      tpu.vector_store %arg6[%c0_87, %c0_88], %326 {strides = array<i32>} : memref<4x32xf32, #tpu.memory_space<vmem>>, vector<4x32xf32>,
    } else {
    }
    %c0 = arith.constant 0 : index
    %c0_1 = arith.constant 0 : index
    %3 = vector.load %arg4[%c0, %c0_1] : memref<1x32xf32, #tpu.memory_space<vmem>>, vector<1x32xf32>
    %c0_2 = arith.constant 0 : index
    %c0_3 = arith.constant 0 : index
    %4 = vector.load %arg6[%c0_2, %c0_3] : memref<4x32xf32, #tpu.memory_space<vmem>>, vector<4x32xf32>
    %c0_i32_4 = arith.constant 0 : i32
    %5 = arith.truncf %4 : vector<4x32xf32> to vector<4x32xbf16>
    %c0_5 = arith.constant 0 : index
    %c0_6 = arith.constant 0 : index
    %6 = vector.load %arg3[%c0_5, %c0_6] : memref<32x96xbf16, #tpu.memory_space<vmem>>, vector<32x96xbf16>
    %cst = arith.constant dense<0.000000e+00> : vector<4x96xf32>
    %7 = tpu.matmul %5, %6, %cst {dimension_numbers = #tpu.dot_dimension_numbers<[1], [0], [0], [1], [0, 0, 1, 1], [], []>} : vector<4x32xbf16>, vector<32x96xbf16>, vector<4x96xf32> -> vector<4x96xf32>
    %8 = arith.index_cast %c0_i32_4 : i32 to index
    %c0_7 = arith.constant 0 : index
    %c0_8 = arith.constant 0 : index
    %9 = vector.load %arg2[%8, %c0_7, %c0_8] : memref<8x4x96xbf16, #tpu.memory_space<vmem>>, vector<1x4x96xbf16>
    %10 = vector.shape_cast %9 : vector<1x4x96xbf16> to vector<4x96xbf16>
    %11 = arith.extf %10 : vector<4x96xbf16> to vector<4x96xf32>
    %12 = vector.extract_strided_slice %11 {offsets = [0, 0], sizes = [4, 32], strides = [1, 1]} : vector<4x96xf32> to vector<4x32xf32>
    %13 = vector.extract_strided_slice %7 {offsets = [0, 0], sizes = [4, 32], strides = [1, 1]} : vector<4x96xf32> to vector<4x32xf32>
    %14 = arith.addf %12, %13 : vector<4x32xf32>
    %15 = arith.negf %14 : vector<4x32xf32>
    %16 = math.exp %15 : vector<4x32xf32>
    %cst_9 = arith.constant 1.000000e+00 : f32
    %17 = vector.broadcast %cst_9 : f32 to vector<4x32xf32>
    %18 = arith.addf %17, %16 : vector<4x32xf32>
    %19 = arith.divf %17, %18 : vector<4x32xf32>
    %20 = vector.extract_strided_slice %11 {offsets = [0, 32], sizes = [4, 32], strides = [1, 1]} : vector<4x96xf32> to vector<4x32xf32>
    %21 = vector.extract_strided_slice %7 {offsets = [0, 32], sizes = [4, 32], strides = [1, 1]} : vector<4x96xf32> to vector<4x32xf32>
    %22 = arith.addf %20, %21 : vector<4x32xf32>
    %23 = arith.negf %22 : vector<4x32xf32>
    %24 = math.exp %23 : vector<4x32xf32>
    %cst_10 = arith.constant 1.000000e+00 : f32
    %25 = vector.broadcast %cst_10 : f32 to vector<4x32xf32>
    %26 = arith.addf %25, %24 : vector<4x32xf32>
    %27 = arith.divf %25, %26 : vector<4x32xf32>
    %28 = vector.extract_strided_slice %11 {offsets = [0, 64], sizes = [4, 32], strides = [1, 1]} : vector<4x96xf32> to vector<4x32xf32>
    %29 = vector.extract_strided_slice %7 {offsets = [0, 64], sizes = [4, 32], strides = [1, 1]} : vector<4x96xf32> to vector<4x32xf32>
    %30 = vector.broadcast %3 : vector<1x32xf32> to vector<4x32xf32>
    %31 = arith.addf %29, %30 : vector<4x32xf32>
    %32 = arith.mulf %19, %31 : vector<4x32xf32>
    %33 = arith.addf %28, %32 : vector<4x32xf32>
    %34 = math.tanh %33 : vector<4x32xf32>
    %cst_11 = arith.constant 1.000000e+00 : f32
    %35 = vector.broadcast %cst_11 : f32 to vector<4x32xf32>
    %36 = arith.subf %35, %27 : vector<4x32xf32>
    %37 = arith.mulf %36, %34 : vector<4x32xf32>
    %38 = arith.mulf %27, %4 : vector<4x32xf32>
    %39 = arith.addf %37, %38 : vector<4x32xf32>
    %40 = arith.truncf %39 : vector<4x32xf32> to vector<4x32xbf16>
    %41 = arith.index_cast %c0_i32_4 : i32 to index
    %c0_12 = arith.constant 0 : index
    %c0_13 = arith.constant 0 : index
    %42 = vector.load %arg5[%41, %c0_12, %c0_13] : memref<8x4x32xbf16, #tpu.memory_space<vmem>>, vector<1x4x32xbf16>
    %43 = vector.shape_cast %42 : vector<1x4x32xbf16> to vector<4x32xbf16>
    %44 = vector.shape_cast %40 : vector<4x32xbf16> to vector<1x4x32xbf16>
    tpu.vector_store %arg5[%41, %c0_12, %c0_13], %44 {strides = array<i32>} : memref<8x4x32xbf16, #tpu.memory_space<vmem>>, vector<1x4x32xbf16>,
    %c1_i32 = arith.constant 1 : i32
    %45 = arith.truncf %39 : vector<4x32xf32> to vector<4x32xbf16>
    %c0_14 = arith.constant 0 : index
    %c0_15 = arith.constant 0 : index
    %46 = vector.load %arg3[%c0_14, %c0_15] : memref<32x96xbf16, #tpu.memory_space<vmem>>, vector<32x96xbf16>
    %cst_16 = arith.constant dense<0.000000e+00> : vector<4x96xf32>
    %47 = tpu.matmul %45, %46, %cst_16 {dimension_numbers = #tpu.dot_dimension_numbers<[1], [0], [0], [1], [0, 0, 1, 1], [], []>} : vector<4x32xbf16>, vector<32x96xbf16>, vector<4x96xf32> -> vector<4x96xf32>
    %48 = arith.index_cast %c1_i32 : i32 to index
    %c0_17 = arith.constant 0 : index
    %c0_18 = arith.constant 0 : index
    %49 = vector.load %arg2[%48, %c0_17, %c0_18] : memref<8x4x96xbf16, #tpu.memory_space<vmem>>, vector<1x4x96xbf16>
    %50 = vector.shape_cast %49 : vector<1x4x96xbf16> to vector<4x96xbf16>
    %51 = arith.extf %50 : vector<4x96xbf16> to vector<4x96xf32>
    %52 = vector.extract_strided_slice %51 {offsets = [0, 0], sizes = [4, 32], strides = [1, 1]} : vector<4x96xf32> to vector<4x32xf32>
    %53 = vector.extract_strided_slice %47 {offsets = [0, 0], sizes = [4, 32], strides = [1, 1]} : vector<4x96xf32> to vector<4x32xf32>
    %54 = arith.addf %52, %53 : vector<4x32xf32>
    %55 = arith.negf %54 : vector<4x32xf32>
    %56 = math.exp %55 : vector<4x32xf32>
    %cst_19 = arith.constant 1.000000e+00 : f32
    %57 = vector.broadcast %cst_19 : f32 to vector<4x32xf32>
    %58 = arith.addf %57, %56 : vector<4x32xf32>
    %59 = arith.divf %57, %58 : vector<4x32xf32>
    %60 = vector.extract_strided_slice %51 {offsets = [0, 32], sizes = [4, 32], strides = [1, 1]} : vector<4x96xf32> to vector<4x32xf32>
    %61 = vector.extract_strided_slice %47 {offsets = [0, 32], sizes = [4, 32], strides = [1, 1]} : vector<4x96xf32> to vector<4x32xf32>
    %62 = arith.addf %60, %61 : vector<4x32xf32>
    %63 = arith.negf %62 : vector<4x32xf32>
    %64 = math.exp %63 : vector<4x32xf32>
    %cst_20 = arith.constant 1.000000e+00 : f32
    %65 = vector.broadcast %cst_20 : f32 to vector<4x32xf32>
    %66 = arith.addf %65, %64 : vector<4x32xf32>
    %67 = arith.divf %65, %66 : vector<4x32xf32>
    %68 = vector.extract_strided_slice %51 {offsets = [0, 64], sizes = [4, 32], strides = [1, 1]} : vector<4x96xf32> to vector<4x32xf32>
    %69 = vector.extract_strided_slice %47 {offsets = [0, 64], sizes = [4, 32], strides = [1, 1]} : vector<4x96xf32> to vector<4x32xf32>
    %70 = vector.broadcast %3 : vector<1x32xf32> to vector<4x32xf32>
    %71 = arith.addf %69, %70 : vector<4x32xf32>
    %72 = arith.mulf %59, %71 : vector<4x32xf32>
    %73 = arith.addf %68, %72 : vector<4x32xf32>
    %74 = math.tanh %73 : vector<4x32xf32>
    %cst_21 = arith.constant 1.000000e+00 : f32
    %75 = vector.broadcast %cst_21 : f32 to vector<4x32xf32>
    %76 = arith.subf %75, %67 : vector<4x32xf32>
    %77 = arith.mulf %76, %74 : vector<4x32xf32>
    %78 = arith.mulf %67, %39 : vector<4x32xf32>
    %79 = arith.addf %77, %78 : vector<4x32xf32>
    %80 = arith.truncf %79 : vector<4x32xf32> to vector<4x32xbf16>
    %81 = arith.index_cast %c1_i32 : i32 to index
    %c0_22 = arith.constant 0 : index
    %c0_23 = arith.constant 0 : index
    %82 = vector.load %arg5[%81, %c0_22, %c0_23] : memref<8x4x32xbf16, #tpu.memory_space<vmem>>, vector<1x4x32xbf16>
    %83 = vector.shape_cast %82 : vector<1x4x32xbf16> to vector<4x32xbf16>
    %84 = vector.shape_cast %80 : vector<4x32xbf16> to vector<1x4x32xbf16>
    tpu.vector_store %arg5[%81, %c0_22, %c0_23], %84 {strides = array<i32>} : memref<8x4x32xbf16, #tpu.memory_space<vmem>>, vector<1x4x32xbf16>,
    %c2_i32 = arith.constant 2 : i32
    %85 = arith.truncf %79 : vector<4x32xf32> to vector<4x32xbf16>
    %c0_24 = arith.constant 0 : index
    %c0_25 = arith.constant 0 : index
    %86 = vector.load %arg3[%c0_24, %c0_25] : memref<32x96xbf16, #tpu.memory_space<vmem>>, vector<32x96xbf16>
    %cst_26 = arith.constant dense<0.000000e+00> : vector<4x96xf32>
    %87 = tpu.matmul %85, %86, %cst_26 {dimension_numbers = #tpu.dot_dimension_numbers<[1], [0], [0], [1], [0, 0, 1, 1], [], []>} : vector<4x32xbf16>, vector<32x96xbf16>, vector<4x96xf32> -> vector<4x96xf32>
    %88 = arith.index_cast %c2_i32 : i32 to index
    %c0_27 = arith.constant 0 : index
    %c0_28 = arith.constant 0 : index
    %89 = vector.load %arg2[%88, %c0_27, %c0_28] : memref<8x4x96xbf16, #tpu.memory_space<vmem>>, vector<1x4x96xbf16>
    %90 = vector.shape_cast %89 : vector<1x4x96xbf16> to vector<4x96xbf16>
    %91 = arith.extf %90 : vector<4x96xbf16> to vector<4x96xf32>
    %92 = vector.extract_strided_slice %91 {offsets = [0, 0], sizes = [4, 32], strides = [1, 1]} : vector<4x96xf32> to vector<4x32xf32>
    %93 = vector.extract_strided_slice %87 {offsets = [0, 0], sizes = [4, 32], strides = [1, 1]} : vector<4x96xf32> to vector<4x32xf32>
    %94 = arith.addf %92, %93 : vector<4x32xf32>
    %95 = arith.negf %94 : vector<4x32xf32>
    %96 = math.exp %95 : vector<4x32xf32>
    %cst_29 = arith.constant 1.000000e+00 : f32
    %97 = vector.broadcast %cst_29 : f32 to vector<4x32xf32>
    %98 = arith.addf %97, %96 : vector<4x32xf32>
    %99 = arith.divf %97, %98 : vector<4x32xf32>
    %100 = vector.extract_strided_slice %91 {offsets = [0, 32], sizes = [4, 32], strides = [1, 1]} : vector<4x96xf32> to vector<4x32xf32>
    %101 = vector.extract_strided_slice %87 {offsets = [0, 32], sizes = [4, 32], strides = [1, 1]} : vector<4x96xf32> to vector<4x32xf32>
    %102 = arith.addf %100, %101 : vector<4x32xf32>
    %103 = arith.negf %102 : vector<4x32xf32>
    %104 = math.exp %103 : vector<4x32xf32>
    %cst_30 = arith.constant 1.000000e+00 : f32
    %105 = vector.broadcast %cst_30 : f32 to vector<4x32xf32>
    %106 = arith.addf %105, %104 : vector<4x32xf32>
    %107 = arith.divf %105, %106 : vector<4x32xf32>
    %108 = vector.extract_strided_slice %91 {offsets = [0, 64], sizes = [4, 32], strides = [1, 1]} : vector<4x96xf32> to vector<4x32xf32>
    %109 = vector.extract_strided_slice %87 {offsets = [0, 64], sizes = [4, 32], strides = [1, 1]} : vector<4x96xf32> to vector<4x32xf32>
    %110 = vector.broadcast %3 : vector<1x32xf32> to vector<4x32xf32>
    %111 = arith.addf %109, %110 : vector<4x32xf32>
    %112 = arith.mulf %99, %111 : vector<4x32xf32>
    %113 = arith.addf %108, %112 : vector<4x32xf32>
    %114 = math.tanh %113 : vector<4x32xf32>
    %cst_31 = arith.constant 1.000000e+00 : f32
    %115 = vector.broadcast %cst_31 : f32 to vector<4x32xf32>
    %116 = arith.subf %115, %107 : vector<4x32xf32>
    %117 = arith.mulf %116, %114 : vector<4x32xf32>
    %118 = arith.mulf %107, %79 : vector<4x32xf32>
    %119 = arith.addf %117, %118 : vector<4x32xf32>
    %120 = arith.truncf %119 : vector<4x32xf32> to vector<4x32xbf16>
    %121 = arith.index_cast %c2_i32 : i32 to index
    %c0_32 = arith.constant 0 : index
    %c0_33 = arith.constant 0 : index
    %122 = vector.load %arg5[%121, %c0_32, %c0_33] : memref<8x4x32xbf16, #tpu.memory_space<vmem>>, vector<1x4x32xbf16>
    %123 = vector.shape_cast %122 : vector<1x4x32xbf16> to vector<4x32xbf16>
    %124 = vector.shape_cast %120 : vector<4x32xbf16> to vector<1x4x32xbf16>
    tpu.vector_store %arg5[%121, %c0_32, %c0_33], %124 {strides = array<i32>} : memref<8x4x32xbf16, #tpu.memory_space<vmem>>, vector<1x4x32xbf16>,
    %c3_i32 = arith.constant 3 : i32
    %125 = arith.truncf %119 : vector<4x32xf32> to vector<4x32xbf16>
    %c0_34 = arith.constant 0 : index
    %c0_35 = arith.constant 0 : index
    %126 = vector.load %arg3[%c0_34, %c0_35] : memref<32x96xbf16, #tpu.memory_space<vmem>>, vector<32x96xbf16>
    %cst_36 = arith.constant dense<0.000000e+00> : vector<4x96xf32>
    %127 = tpu.matmul %125, %126, %cst_36 {dimension_numbers = #tpu.dot_dimension_numbers<[1], [0], [0], [1], [0, 0, 1, 1], [], []>} : vector<4x32xbf16>, vector<32x96xbf16>, vector<4x96xf32> -> vector<4x96xf32>
    %128 = arith.index_cast %c3_i32 : i32 to index
    %c0_37 = arith.constant 0 : index
    %c0_38 = arith.constant 0 : index
    %129 = vector.load %arg2[%128, %c0_37, %c0_38] : memref<8x4x96xbf16, #tpu.memory_space<vmem>>, vector<1x4x96xbf16>
    %130 = vector.shape_cast %129 : vector<1x4x96xbf16> to vector<4x96xbf16>
    %131 = arith.extf %130 : vector<4x96xbf16> to vector<4x96xf32>
    %132 = vector.extract_strided_slice %131 {offsets = [0, 0], sizes = [4, 32], strides = [1, 1]} : vector<4x96xf32> to vector<4x32xf32>
    %133 = vector.extract_strided_slice %127 {offsets = [0, 0], sizes = [4, 32], strides = [1, 1]} : vector<4x96xf32> to vector<4x32xf32>
    %134 = arith.addf %132, %133 : vector<4x32xf32>
    %135 = arith.negf %134 : vector<4x32xf32>
    %136 = math.exp %135 : vector<4x32xf32>
    %cst_39 = arith.constant 1.000000e+00 : f32
    %137 = vector.broadcast %cst_39 : f32 to vector<4x32xf32>
    %138 = arith.addf %137, %136 : vector<4x32xf32>
    %139 = arith.divf %137, %138 : vector<4x32xf32>
    %140 = vector.extract_strided_slice %131 {offsets = [0, 32], sizes = [4, 32], strides = [1, 1]} : vector<4x96xf32> to vector<4x32xf32>
    %141 = vector.extract_strided_slice %127 {offsets = [0, 32], sizes = [4, 32], strides = [1, 1]} : vector<4x96xf32> to vector<4x32xf32>
    %142 = arith.addf %140, %141 : vector<4x32xf32>
    %143 = arith.negf %142 : vector<4x32xf32>
    %144 = math.exp %143 : vector<4x32xf32>
    %cst_40 = arith.constant 1.000000e+00 : f32
    %145 = vector.broadcast %cst_40 : f32 to vector<4x32xf32>
    %146 = arith.addf %145, %144 : vector<4x32xf32>
    %147 = arith.divf %145, %146 : vector<4x32xf32>
    %148 = vector.extract_strided_slice %131 {offsets = [0, 64], sizes = [4, 32], strides = [1, 1]} : vector<4x96xf32> to vector<4x32xf32>
    %149 = vector.extract_strided_slice %127 {offsets = [0, 64], sizes = [4, 32], strides = [1, 1]} : vector<4x96xf32> to vector<4x32xf32>
    %150 = vector.broadcast %3 : vector<1x32xf32> to vector<4x32xf32>
    %151 = arith.addf %149, %150 : vector<4x32xf32>
    %152 = arith.mulf %139, %151 : vector<4x32xf32>
    %153 = arith.addf %148, %152 : vector<4x32xf32>
    %154 = math.tanh %153 : vector<4x32xf32>
    %cst_41 = arith.constant 1.000000e+00 : f32
    %155 = vector.broadcast %cst_41 : f32 to vector<4x32xf32>
    %156 = arith.subf %155, %147 : vector<4x32xf32>
    %157 = arith.mulf %156, %154 : vector<4x32xf32>
    %158 = arith.mulf %147, %119 : vector<4x32xf32>
    %159 = arith.addf %157, %158 : vector<4x32xf32>
    %160 = arith.truncf %159 : vector<4x32xf32> to vector<4x32xbf16>
    %161 = arith.index_cast %c3_i32 : i32 to index
    %c0_42 = arith.constant 0 : index
    %c0_43 = arith.constant 0 : index
    %162 = vector.load %arg5[%161, %c0_42, %c0_43] : memref<8x4x32xbf16, #tpu.memory_space<vmem>>, vector<1x4x32xbf16>
    %163 = vector.shape_cast %162 : vector<1x4x32xbf16> to vector<4x32xbf16>
    %164 = vector.shape_cast %160 : vector<4x32xbf16> to vector<1x4x32xbf16>
    tpu.vector_store %arg5[%161, %c0_42, %c0_43], %164 {strides = array<i32>} : memref<8x4x32xbf16, #tpu.memory_space<vmem>>, vector<1x4x32xbf16>,
    %c4_i32 = arith.constant 4 : i32
    %165 = arith.truncf %159 : vector<4x32xf32> to vector<4x32xbf16>
    %c0_44 = arith.constant 0 : index
    %c0_45 = arith.constant 0 : index
    %166 = vector.load %arg3[%c0_44, %c0_45] : memref<32x96xbf16, #tpu.memory_space<vmem>>, vector<32x96xbf16>
    %cst_46 = arith.constant dense<0.000000e+00> : vector<4x96xf32>
    %167 = tpu.matmul %165, %166, %cst_46 {dimension_numbers = #tpu.dot_dimension_numbers<[1], [0], [0], [1], [0, 0, 1, 1], [], []>} : vector<4x32xbf16>, vector<32x96xbf16>, vector<4x96xf32> -> vector<4x96xf32>
    %168 = arith.index_cast %c4_i32 : i32 to index
    %c0_47 = arith.constant 0 : index
    %c0_48 = arith.constant 0 : index
    %169 = vector.load %arg2[%168, %c0_47, %c0_48] : memref<8x4x96xbf16, #tpu.memory_space<vmem>>, vector<1x4x96xbf16>
    %170 = vector.shape_cast %169 : vector<1x4x96xbf16> to vector<4x96xbf16>
    %171 = arith.extf %170 : vector<4x96xbf16> to vector<4x96xf32>
    %172 = vector.extract_strided_slice %171 {offsets = [0, 0], sizes = [4, 32], strides = [1, 1]} : vector<4x96xf32> to vector<4x32xf32>
    %173 = vector.extract_strided_slice %167 {offsets = [0, 0], sizes = [4, 32], strides = [1, 1]} : vector<4x96xf32> to vector<4x32xf32>
    %174 = arith.addf %172, %173 : vector<4x32xf32>
    %175 = arith.negf %174 : vector<4x32xf32>
    %176 = math.exp %175 : vector<4x32xf32>
    %cst_49 = arith.constant 1.000000e+00 : f32
    %177 = vector.broadcast %cst_49 : f32 to vector<4x32xf32>
    %178 = arith.addf %177, %176 : vector<4x32xf32>
    %179 = arith.divf %177, %178 : vector<4x32xf32>
    %180 = vector.extract_strided_slice %171 {offsets = [0, 32], sizes = [4, 32], strides = [1, 1]} : vector<4x96xf32> to vector<4x32xf32>
    %181 = vector.extract_strided_slice %167 {offsets = [0, 32], sizes = [4, 32], strides = [1, 1]} : vector<4x96xf32> to vector<4x32xf32>
    %182 = arith.addf %180, %181 : vector<4x32xf32>
    %183 = arith.negf %182 : vector<4x32xf32>
    %184 = math.exp %183 : vector<4x32xf32>
    %cst_50 = arith.constant 1.000000e+00 : f32
    %185 = vector.broadcast %cst_50 : f32 to vector<4x32xf32>
    %186 = arith.addf %185, %184 : vector<4x32xf32>
    %187 = arith.divf %185, %186 : vector<4x32xf32>
    %188 = vector.extract_strided_slice %171 {offsets = [0, 64], sizes = [4, 32], strides = [1, 1]} : vector<4x96xf32> to vector<4x32xf32>
    %189 = vector.extract_strided_slice %167 {offsets = [0, 64], sizes = [4, 32], strides = [1, 1]} : vector<4x96xf32> to vector<4x32xf32>
    %190 = vector.broadcast %3 : vector<1x32xf32> to vector<4x32xf32>
    %191 = arith.addf %189, %190 : vector<4x32xf32>
    %192 = arith.mulf %179, %191 : vector<4x32xf32>
    %193 = arith.addf %188, %192 : vector<4x32xf32>
    %194 = math.tanh %193 : vector<4x32xf32>
    %cst_51 = arith.constant 1.000000e+00 : f32
    %195 = vector.broadcast %cst_51 : f32 to vector<4x32xf32>
    %196 = arith.subf %195, %187 : vector<4x32xf32>
    %197 = arith.mulf %196, %194 : vector<4x32xf32>
    %198 = arith.mulf %187, %159 : vector<4x32xf32>
    %199 = arith.addf %197, %198 : vector<4x32xf32>
    %200 = arith.truncf %199 : vector<4x32xf32> to vector<4x32xbf16>
    %201 = arith.index_cast %c4_i32 : i32 to index
    %c0_52 = arith.constant 0 : index
    %c0_53 = arith.constant 0 : index
    %202 = vector.load %arg5[%201, %c0_52, %c0_53] : memref<8x4x32xbf16, #tpu.memory_space<vmem>>, vector<1x4x32xbf16>
    %203 = vector.shape_cast %202 : vector<1x4x32xbf16> to vector<4x32xbf16>
    %204 = vector.shape_cast %200 : vector<4x32xbf16> to vector<1x4x32xbf16>
    tpu.vector_store %arg5[%201, %c0_52, %c0_53], %204 {strides = array<i32>} : memref<8x4x32xbf16, #tpu.memory_space<vmem>>, vector<1x4x32xbf16>,
    %c5_i32 = arith.constant 5 : i32
    %205 = arith.truncf %199 : vector<4x32xf32> to vector<4x32xbf16>
    %c0_54 = arith.constant 0 : index
    %c0_55 = arith.constant 0 : index
    %206 = vector.load %arg3[%c0_54, %c0_55] : memref<32x96xbf16, #tpu.memory_space<vmem>>, vector<32x96xbf16>
    %cst_56 = arith.constant dense<0.000000e+00> : vector<4x96xf32>
    %207 = tpu.matmul %205, %206, %cst_56 {dimension_numbers = #tpu.dot_dimension_numbers<[1], [0], [0], [1], [0, 0, 1, 1], [], []>} : vector<4x32xbf16>, vector<32x96xbf16>, vector<4x96xf32> -> vector<4x96xf32>
    %208 = arith.index_cast %c5_i32 : i32 to index
    %c0_57 = arith.constant 0 : index
    %c0_58 = arith.constant 0 : index
    %209 = vector.load %arg2[%208, %c0_57, %c0_58] : memref<8x4x96xbf16, #tpu.memory_space<vmem>>, vector<1x4x96xbf16>
    %210 = vector.shape_cast %209 : vector<1x4x96xbf16> to vector<4x96xbf16>
    %211 = arith.extf %210 : vector<4x96xbf16> to vector<4x96xf32>
    %212 = vector.extract_strided_slice %211 {offsets = [0, 0], sizes = [4, 32], strides = [1, 1]} : vector<4x96xf32> to vector<4x32xf32>
    %213 = vector.extract_strided_slice %207 {offsets = [0, 0], sizes = [4, 32], strides = [1, 1]} : vector<4x96xf32> to vector<4x32xf32>
    %214 = arith.addf %212, %213 : vector<4x32xf32>
    %215 = arith.negf %214 : vector<4x32xf32>
    %216 = math.exp %215 : vector<4x32xf32>
    %cst_59 = arith.constant 1.000000e+00 : f32
    %217 = vector.broadcast %cst_59 : f32 to vector<4x32xf32>
    %218 = arith.addf %217, %216 : vector<4x32xf32>
    %219 = arith.divf %217, %218 : vector<4x32xf32>
    %220 = vector.extract_strided_slice %211 {offsets = [0, 32], sizes = [4, 32], strides = [1, 1]} : vector<4x96xf32> to vector<4x32xf32>
    %221 = vector.extract_strided_slice %207 {offsets = [0, 32], sizes = [4, 32], strides = [1, 1]} : vector<4x96xf32> to vector<4x32xf32>
    %222 = arith.addf %220, %221 : vector<4x32xf32>
    %223 = arith.negf %222 : vector<4x32xf32>
    %224 = math.exp %223 : vector<4x32xf32>
    %cst_60 = arith.constant 1.000000e+00 : f32
    %225 = vector.broadcast %cst_60 : f32 to vector<4x32xf32>
    %226 = arith.addf %225, %224 : vector<4x32xf32>
    %227 = arith.divf %225, %226 : vector<4x32xf32>
    %228 = vector.extract_strided_slice %211 {offsets = [0, 64], sizes = [4, 32], strides = [1, 1]} : vector<4x96xf32> to vector<4x32xf32>
    %229 = vector.extract_strided_slice %207 {offsets = [0, 64], sizes = [4, 32], strides = [1, 1]} : vector<4x96xf32> to vector<4x32xf32>
    %230 = vector.broadcast %3 : vector<1x32xf32> to vector<4x32xf32>
    %231 = arith.addf %229, %230 : vector<4x32xf32>
    %232 = arith.mulf %219, %231 : vector<4x32xf32>
    %233 = arith.addf %228, %232 : vector<4x32xf32>
    %234 = math.tanh %233 : vector<4x32xf32>
    %cst_61 = arith.constant 1.000000e+00 : f32
    %235 = vector.broadcast %cst_61 : f32 to vector<4x32xf32>
    %236 = arith.subf %235, %227 : vector<4x32xf32>
    %237 = arith.mulf %236, %234 : vector<4x32xf32>
    %238 = arith.mulf %227, %199 : vector<4x32xf32>
    %239 = arith.addf %237, %238 : vector<4x32xf32>
    %240 = arith.truncf %239 : vector<4x32xf32> to vector<4x32xbf16>
    %241 = arith.index_cast %c5_i32 : i32 to index
    %c0_62 = arith.constant 0 : index
    %c0_63 = arith.constant 0 : index
    %242 = vector.load %arg5[%241, %c0_62, %c0_63] : memref<8x4x32xbf16, #tpu.memory_space<vmem>>, vector<1x4x32xbf16>
    %243 = vector.shape_cast %242 : vector<1x4x32xbf16> to vector<4x32xbf16>
    %244 = vector.shape_cast %240 : vector<4x32xbf16> to vector<1x4x32xbf16>
    tpu.vector_store %arg5[%241, %c0_62, %c0_63], %244 {strides = array<i32>} : memref<8x4x32xbf16, #tpu.memory_space<vmem>>, vector<1x4x32xbf16>,
    %c6_i32 = arith.constant 6 : i32
    %245 = arith.truncf %239 : vector<4x32xf32> to vector<4x32xbf16>
    %c0_64 = arith.constant 0 : index
    %c0_65 = arith.constant 0 : index
    %246 = vector.load %arg3[%c0_64, %c0_65] : memref<32x96xbf16, #tpu.memory_space<vmem>>, vector<32x96xbf16>
    %cst_66 = arith.constant dense<0.000000e+00> : vector<4x96xf32>
    %247 = tpu.matmul %245, %246, %cst_66 {dimension_numbers = #tpu.dot_dimension_numbers<[1], [0], [0], [1], [0, 0, 1, 1], [], []>} : vector<4x32xbf16>, vector<32x96xbf16>, vector<4x96xf32> -> vector<4x96xf32>
    %248 = arith.index_cast %c6_i32 : i32 to index
    %c0_67 = arith.constant 0 : index
    %c0_68 = arith.constant 0 : index
    %249 = vector.load %arg2[%248, %c0_67, %c0_68] : memref<8x4x96xbf16, #tpu.memory_space<vmem>>, vector<1x4x96xbf16>
    %250 = vector.shape_cast %249 : vector<1x4x96xbf16> to vector<4x96xbf16>
    %251 = arith.extf %250 : vector<4x96xbf16> to vector<4x96xf32>
    %252 = vector.extract_strided_slice %251 {offsets = [0, 0], sizes = [4, 32], strides = [1, 1]} : vector<4x96xf32> to vector<4x32xf32>
    %253 = vector.extract_strided_slice %247 {offsets = [0, 0], sizes = [4, 32], strides = [1, 1]} : vector<4x96xf32> to vector<4x32xf32>
    %254 = arith.addf %252, %253 : vector<4x32xf32>
    %255 = arith.negf %254 : vector<4x32xf32>
    %256 = math.exp %255 : vector<4x32xf32>
    %cst_69 = arith.constant 1.000000e+00 : f32
    %257 = vector.broadcast %cst_69 : f32 to vector<4x32xf32>
    %258 = arith.addf %257, %256 : vector<4x32xf32>
    %259 = arith.divf %257, %258 : vector<4x32xf32>
    %260 = vector.extract_strided_slice %251 {offsets = [0, 32], sizes = [4, 32], strides = [1, 1]} : vector<4x96xf32> to vector<4x32xf32>
    %261 = vector.extract_strided_slice %247 {offsets = [0, 32], sizes = [4, 32], strides = [1, 1]} : vector<4x96xf32> to vector<4x32xf32>
    %262 = arith.addf %260, %261 : vector<4x32xf32>
    %263 = arith.negf %262 : vector<4x32xf32>
    %264 = math.exp %263 : vector<4x32xf32>
    %cst_70 = arith.constant 1.000000e+00 : f32
    %265 = vector.broadcast %cst_70 : f32 to vector<4x32xf32>
    %266 = arith.addf %265, %264 : vector<4x32xf32>
    %267 = arith.divf %265, %266 : vector<4x32xf32>
    %268 = vector.extract_strided_slice %251 {offsets = [0, 64], sizes = [4, 32], strides = [1, 1]} : vector<4x96xf32> to vector<4x32xf32>
    %269 = vector.extract_strided_slice %247 {offsets = [0, 64], sizes = [4, 32], strides = [1, 1]} : vector<4x96xf32> to vector<4x32xf32>
    %270 = vector.broadcast %3 : vector<1x32xf32> to vector<4x32xf32>
    %271 = arith.addf %269, %270 : vector<4x32xf32>
    %272 = arith.mulf %259, %271 : vector<4x32xf32>
    %273 = arith.addf %268, %272 : vector<4x32xf32>
    %274 = math.tanh %273 : vector<4x32xf32>
    %cst_71 = arith.constant 1.000000e+00 : f32
    %275 = vector.broadcast %cst_71 : f32 to vector<4x32xf32>
    %276 = arith.subf %275, %267 : vector<4x32xf32>
    %277 = arith.mulf %276, %274 : vector<4x32xf32>
    %278 = arith.mulf %267, %239 : vector<4x32xf32>
    %279 = arith.addf %277, %278 : vector<4x32xf32>
    %280 = arith.truncf %279 : vector<4x32xf32> to vector<4x32xbf16>
    %281 = arith.index_cast %c6_i32 : i32 to index
    %c0_72 = arith.constant 0 : index
    %c0_73 = arith.constant 0 : index
    %282 = vector.load %arg5[%281, %c0_72, %c0_73] : memref<8x4x32xbf16, #tpu.memory_space<vmem>>, vector<1x4x32xbf16>
    %283 = vector.shape_cast %282 : vector<1x4x32xbf16> to vector<4x32xbf16>
    %284 = vector.shape_cast %280 : vector<4x32xbf16> to vector<1x4x32xbf16>
    tpu.vector_store %arg5[%281, %c0_72, %c0_73], %284 {strides = array<i32>} : memref<8x4x32xbf16, #tpu.memory_space<vmem>>, vector<1x4x32xbf16>,
    %c7_i32 = arith.constant 7 : i32
    %285 = arith.truncf %279 : vector<4x32xf32> to vector<4x32xbf16>
    %c0_74 = arith.constant 0 : index
    %c0_75 = arith.constant 0 : index
    %286 = vector.load %arg3[%c0_74, %c0_75] : memref<32x96xbf16, #tpu.memory_space<vmem>>, vector<32x96xbf16>
    %cst_76 = arith.constant dense<0.000000e+00> : vector<4x96xf32>
    %287 = tpu.matmul %285, %286, %cst_76 {dimension_numbers = #tpu.dot_dimension_numbers<[1], [0], [0], [1], [0, 0, 1, 1], [], []>} : vector<4x32xbf16>, vector<32x96xbf16>, vector<4x96xf32> -> vector<4x96xf32>
    %288 = arith.index_cast %c7_i32 : i32 to index
    %c0_77 = arith.constant 0 : index
    %c0_78 = arith.constant 0 : index
    %289 = vector.load %arg2[%288, %c0_77, %c0_78] : memref<8x4x96xbf16, #tpu.memory_space<vmem>>, vector<1x4x96xbf16>
    %290 = vector.shape_cast %289 : vector<1x4x96xbf16> to vector<4x96xbf16>
    %291 = arith.extf %290 : vector<4x96xbf16> to vector<4x96xf32>
    %292 = vector.extract_strided_slice %291 {offsets = [0, 0], sizes = [4, 32], strides = [1, 1]} : vector<4x96xf32> to vector<4x32xf32>
    %293 = vector.extract_strided_slice %287 {offsets = [0, 0], sizes = [4, 32], strides = [1, 1]} : vector<4x96xf32> to vector<4x32xf32>
    %294 = arith.addf %292, %293 : vector<4x32xf32>
    %295 = arith.negf %294 : vector<4x32xf32>
    %296 = math.exp %295 : vector<4x32xf32>
    %cst_79 = arith.constant 1.000000e+00 : f32
    %297 = vector.broadcast %cst_79 : f32 to vector<4x32xf32>
    %298 = arith.addf %297, %296 : vector<4x32xf32>
    %299 = arith.divf %297, %298 : vector<4x32xf32>
    %300 = vector.extract_strided_slice %291 {offsets = [0, 32], sizes = [4, 32], strides = [1, 1]} : vector<4x96xf32> to vector<4x32xf32>
    %301 = vector.extract_strided_slice %287 {offsets = [0, 32], sizes = [4, 32], strides = [1, 1]} : vector<4x96xf32> to vector<4x32xf32>
    %302 = arith.addf %300, %301 : vector<4x32xf32>
    %303 = arith.negf %302 : vector<4x32xf32>
    %304 = math.exp %303 : vector<4x32xf32>
    %cst_80 = arith.constant 1.000000e+00 : f32
    %305 = vector.broadcast %cst_80 : f32 to vector<4x32xf32>
    %306 = arith.addf %305, %304 : vector<4x32xf32>
    %307 = arith.divf %305, %306 : vector<4x32xf32>
    %308 = vector.extract_strided_slice %291 {offsets = [0, 64], sizes = [4, 32], strides = [1, 1]} : vector<4x96xf32> to vector<4x32xf32>
    %309 = vector.extract_strided_slice %287 {offsets = [0, 64], sizes = [4, 32], strides = [1, 1]} : vector<4x96xf32> to vector<4x32xf32>
    %310 = vector.broadcast %3 : vector<1x32xf32> to vector<4x32xf32>
    %311 = arith.addf %309, %310 : vector<4x32xf32>
    %312 = arith.mulf %299, %311 : vector<4x32xf32>
    %313 = arith.addf %308, %312 : vector<4x32xf32>
    %314 = math.tanh %313 : vector<4x32xf32>
    %cst_81 = arith.constant 1.000000e+00 : f32
    %315 = vector.broadcast %cst_81 : f32 to vector<4x32xf32>
    %316 = arith.subf %315, %307 : vector<4x32xf32>
    %317 = arith.mulf %316, %314 : vector<4x32xf32>
    %318 = arith.mulf %307, %279 : vector<4x32xf32>
    %319 = arith.addf %317, %318 : vector<4x32xf32>
    %320 = arith.truncf %319 : vector<4x32xf32> to vector<4x32xbf16>
    %321 = arith.index_cast %c7_i32 : i32 to index
    %c0_82 = arith.constant 0 : index
    %c0_83 = arith.constant 0 : index
    %322 = vector.load %arg5[%321, %c0_82, %c0_83] : memref<8x4x32xbf16, #tpu.memory_space<vmem>>, vector<1x4x32xbf16>
    %323 = vector.shape_cast %322 : vector<1x4x32xbf16> to vector<4x32xbf16>
    %324 = vector.shape_cast %320 : vector<4x32xbf16> to vector<1x4x32xbf16>
    tpu.vector_store %arg5[%321, %c0_82, %c0_83], %324 {strides = array<i32>} : memref<8x4x32xbf16, #tpu.memory_space<vmem>>, vector<1x4x32xbf16>,
    %c8_i32 = arith.constant 8 : i32
    %c0_84 = arith.constant 0 : index
    %c0_85 = arith.constant 0 : index
    %325 = vector.load %arg6[%c0_84, %c0_85] : memref<4x32xf32, #tpu.memory_space<vmem>>, vector<4x32xf32>
    tpu.vector_store %arg6[%c0_84, %c0_85], %319 {strides = array<i32>} : memref<4x32xf32, #tpu.memory_space<vmem>>, vector<4x32xf32>,
    return
  }
  func.func @transform_0(%arg0: i32, %arg1: i32) -> (i32, i32, i32) {
    %c0_i32 = arith.constant 0 : i32
    %c0_i32_0 = arith.constant 0 : i32
    return %arg1, %arg0, %c0_i32 : i32, i32, i32
  }
  func.func @transform_1(%arg0: i32, %arg1: i32) -> (i32, i32) {
    %c0_i32 = arith.constant 0 : i32
    %c0_i32_0 = arith.constant 0 : i32
    %c0_i32_1 = arith.constant 0 : i32
    return %c0_i32, %c0_i32_0 : i32, i32
  }
  func.func @transform_2(%arg0: i32, %arg1: i32) -> (i32, i32) {
    %c0_i32 = arith.constant 0 : i32
    %c0_i32_0 = arith.constant 0 : i32
    %c0_i32_1 = arith.constant 0 : i32
    return %c0_i32, %c0_i32_0 : i32, i32
  }
  func.func @transform_3(%arg0: i32, %arg1: i32) -> (i32, i32, i32) {
    %c0_i32 = arith.constant 0 : i32
    %c0_i32_0 = arith.constant 0 : i32
    return %arg1, %arg0, %c0_i32 : i32, i32, i32
  }
}

module attributes {stable_mosaic.version = 11 : i64} {
  func.func @gru_last_mlp_kernel(%arg0: i32, %arg1: i32, %arg2: memref<8x4x96xbf16, #tpu.memory_space<vmem>>, %arg3: memref<32x96xbf16, #tpu.memory_space<vmem>>, %arg4: memref<1x32xf32, #tpu.memory_space<vmem>>, %arg5: memref<32x32xbf16, #tpu.memory_space<vmem>>, %arg6: memref<1x32xf32, #tpu.memory_space<vmem>>, %arg7: memref<32x3xbf16, #tpu.memory_space<vmem>>, %arg8: memref<1x3xf32, #tpu.memory_space<vmem>>, %arg9: memref<4x3xf32, #tpu.memory_space<vmem>>, %arg10: memref<4x32xf32, #tpu.memory_space<vmem>>) attributes {dimension_semantics = [#tpu.dimension_semantics<parallel>, #tpu.dimension_semantics<arbitrary>], iteration_bounds = array<i64: 1, 1>, scalar_prefetch = 0 : i64, scratch_operands = 1 : i64, tpu.core_type = #tpu.core_type<tc>, window_params = [{transform_indices = @transform_0, window_bounds = array<i64: 8, 4, 96>}, {pipeline_mode = #tpu.pipeline_mode<synchronous>, transform_indices = @transform_1, window_bounds = array<i64: 32, 96>}, {pipeline_mode = #tpu.pipeline_mode<synchronous>, transform_indices = @transform_2, window_bounds = array<i64: 1, 32>}, {pipeline_mode = #tpu.pipeline_mode<synchronous>, transform_indices = @transform_3, window_bounds = array<i64: 32, 32>}, {pipeline_mode = #tpu.pipeline_mode<synchronous>, transform_indices = @transform_4, window_bounds = array<i64: 1, 32>}, {pipeline_mode = #tpu.pipeline_mode<synchronous>, transform_indices = @transform_5, window_bounds = array<i64: 32, 3>}, {pipeline_mode = #tpu.pipeline_mode<synchronous>, transform_indices = @transform_6, window_bounds = array<i64: 1, 3>}, {transform_indices = @transform_7, window_bounds = array<i64: 4, 3>}]} {
    %c0_i32 = arith.constant 0 : i32
    %0 = arith.cmpi eq, %arg1, %c0_i32 : i32
    %1 = arith.extui %0 : i1 to i32
    %c0_i32_0 = arith.constant 0 : i32
    %2 = arith.cmpi ne, %1, %c0_i32_0 : i32
    scf.if %2 {
      %cst_72 = arith.constant 0.000000e+00 : f32
      %289 = vector.broadcast %cst_72 : f32 to vector<4x32xf32>
      %c0_73 = arith.constant 0 : index
      %c0_74 = arith.constant 0 : index
      %290 = vector.load %arg10[%c0_73, %c0_74] : memref<4x32xf32, #tpu.memory_space<vmem>>, vector<4x32xf32>
      tpu.vector_store %arg10[%c0_73, %c0_74], %289 {strides = array<i32>} : memref<4x32xf32, #tpu.memory_space<vmem>>, vector<4x32xf32>,
    } else {
    }
    %c0 = arith.constant 0 : index
    %c0_1 = arith.constant 0 : index
    %3 = vector.load %arg4[%c0, %c0_1] : memref<1x32xf32, #tpu.memory_space<vmem>>, vector<1x32xf32>
    %c0_2 = arith.constant 0 : index
    %c0_3 = arith.constant 0 : index
    %4 = vector.load %arg10[%c0_2, %c0_3] : memref<4x32xf32, #tpu.memory_space<vmem>>, vector<4x32xf32>
    %c0_i32_4 = arith.constant 0 : i32
    %5 = arith.truncf %4 : vector<4x32xf32> to vector<4x32xbf16>
    %c0_5 = arith.constant 0 : index
    %c0_6 = arith.constant 0 : index
    %6 = vector.load %arg3[%c0_5, %c0_6] : memref<32x96xbf16, #tpu.memory_space<vmem>>, vector<32x96xbf16>
    %cst = arith.constant dense<0.000000e+00> : vector<4x96xf32>
    %7 = tpu.matmul %5, %6, %cst {dimension_numbers = #tpu.dot_dimension_numbers<[1], [0], [0], [1], [0, 0, 1, 1], [], []>} : vector<4x32xbf16>, vector<32x96xbf16>, vector<4x96xf32> -> vector<4x96xf32>
    %8 = arith.index_cast %c0_i32_4 : i32 to index
    %c0_7 = arith.constant 0 : index
    %c0_8 = arith.constant 0 : index
    %9 = vector.load %arg2[%8, %c0_7, %c0_8] : memref<8x4x96xbf16, #tpu.memory_space<vmem>>, vector<1x4x96xbf16>
    %10 = vector.shape_cast %9 : vector<1x4x96xbf16> to vector<4x96xbf16>
    %11 = arith.extf %10 : vector<4x96xbf16> to vector<4x96xf32>
    %12 = vector.extract_strided_slice %11 {offsets = [0, 0], sizes = [4, 32], strides = [1, 1]} : vector<4x96xf32> to vector<4x32xf32>
    %13 = vector.extract_strided_slice %7 {offsets = [0, 0], sizes = [4, 32], strides = [1, 1]} : vector<4x96xf32> to vector<4x32xf32>
    %14 = arith.addf %12, %13 : vector<4x32xf32>
    %15 = arith.negf %14 : vector<4x32xf32>
    %16 = math.exp %15 : vector<4x32xf32>
    %cst_9 = arith.constant 1.000000e+00 : f32
    %17 = vector.broadcast %cst_9 : f32 to vector<4x32xf32>
    %18 = arith.addf %17, %16 : vector<4x32xf32>
    %19 = arith.divf %17, %18 : vector<4x32xf32>
    %20 = vector.extract_strided_slice %11 {offsets = [0, 32], sizes = [4, 32], strides = [1, 1]} : vector<4x96xf32> to vector<4x32xf32>
    %21 = vector.extract_strided_slice %7 {offsets = [0, 32], sizes = [4, 32], strides = [1, 1]} : vector<4x96xf32> to vector<4x32xf32>
    %22 = arith.addf %20, %21 : vector<4x32xf32>
    %23 = arith.negf %22 : vector<4x32xf32>
    %24 = math.exp %23 : vector<4x32xf32>
    %cst_10 = arith.constant 1.000000e+00 : f32
    %25 = vector.broadcast %cst_10 : f32 to vector<4x32xf32>
    %26 = arith.addf %25, %24 : vector<4x32xf32>
    %27 = arith.divf %25, %26 : vector<4x32xf32>
    %28 = vector.extract_strided_slice %11 {offsets = [0, 64], sizes = [4, 32], strides = [1, 1]} : vector<4x96xf32> to vector<4x32xf32>
    %29 = vector.extract_strided_slice %7 {offsets = [0, 64], sizes = [4, 32], strides = [1, 1]} : vector<4x96xf32> to vector<4x32xf32>
    %30 = vector.broadcast %3 : vector<1x32xf32> to vector<4x32xf32>
    %31 = arith.addf %29, %30 : vector<4x32xf32>
    %32 = arith.mulf %19, %31 : vector<4x32xf32>
    %33 = arith.addf %28, %32 : vector<4x32xf32>
    %34 = math.tanh %33 : vector<4x32xf32>
    %cst_11 = arith.constant 1.000000e+00 : f32
    %35 = vector.broadcast %cst_11 : f32 to vector<4x32xf32>
    %36 = arith.subf %35, %27 : vector<4x32xf32>
    %37 = arith.mulf %36, %34 : vector<4x32xf32>
    %38 = arith.mulf %27, %4 : vector<4x32xf32>
    %39 = arith.addf %37, %38 : vector<4x32xf32>
    %c1_i32 = arith.constant 1 : i32
    %40 = arith.truncf %39 : vector<4x32xf32> to vector<4x32xbf16>
    %c0_12 = arith.constant 0 : index
    %c0_13 = arith.constant 0 : index
    %41 = vector.load %arg3[%c0_12, %c0_13] : memref<32x96xbf16, #tpu.memory_space<vmem>>, vector<32x96xbf16>
    %cst_14 = arith.constant dense<0.000000e+00> : vector<4x96xf32>
    %42 = tpu.matmul %40, %41, %cst_14 {dimension_numbers = #tpu.dot_dimension_numbers<[1], [0], [0], [1], [0, 0, 1, 1], [], []>} : vector<4x32xbf16>, vector<32x96xbf16>, vector<4x96xf32> -> vector<4x96xf32>
    %43 = arith.index_cast %c1_i32 : i32 to index
    %c0_15 = arith.constant 0 : index
    %c0_16 = arith.constant 0 : index
    %44 = vector.load %arg2[%43, %c0_15, %c0_16] : memref<8x4x96xbf16, #tpu.memory_space<vmem>>, vector<1x4x96xbf16>
    %45 = vector.shape_cast %44 : vector<1x4x96xbf16> to vector<4x96xbf16>
    %46 = arith.extf %45 : vector<4x96xbf16> to vector<4x96xf32>
    %47 = vector.extract_strided_slice %46 {offsets = [0, 0], sizes = [4, 32], strides = [1, 1]} : vector<4x96xf32> to vector<4x32xf32>
    %48 = vector.extract_strided_slice %42 {offsets = [0, 0], sizes = [4, 32], strides = [1, 1]} : vector<4x96xf32> to vector<4x32xf32>
    %49 = arith.addf %47, %48 : vector<4x32xf32>
    %50 = arith.negf %49 : vector<4x32xf32>
    %51 = math.exp %50 : vector<4x32xf32>
    %cst_17 = arith.constant 1.000000e+00 : f32
    %52 = vector.broadcast %cst_17 : f32 to vector<4x32xf32>
    %53 = arith.addf %52, %51 : vector<4x32xf32>
    %54 = arith.divf %52, %53 : vector<4x32xf32>
    %55 = vector.extract_strided_slice %46 {offsets = [0, 32], sizes = [4, 32], strides = [1, 1]} : vector<4x96xf32> to vector<4x32xf32>
    %56 = vector.extract_strided_slice %42 {offsets = [0, 32], sizes = [4, 32], strides = [1, 1]} : vector<4x96xf32> to vector<4x32xf32>
    %57 = arith.addf %55, %56 : vector<4x32xf32>
    %58 = arith.negf %57 : vector<4x32xf32>
    %59 = math.exp %58 : vector<4x32xf32>
    %cst_18 = arith.constant 1.000000e+00 : f32
    %60 = vector.broadcast %cst_18 : f32 to vector<4x32xf32>
    %61 = arith.addf %60, %59 : vector<4x32xf32>
    %62 = arith.divf %60, %61 : vector<4x32xf32>
    %63 = vector.extract_strided_slice %46 {offsets = [0, 64], sizes = [4, 32], strides = [1, 1]} : vector<4x96xf32> to vector<4x32xf32>
    %64 = vector.extract_strided_slice %42 {offsets = [0, 64], sizes = [4, 32], strides = [1, 1]} : vector<4x96xf32> to vector<4x32xf32>
    %65 = vector.broadcast %3 : vector<1x32xf32> to vector<4x32xf32>
    %66 = arith.addf %64, %65 : vector<4x32xf32>
    %67 = arith.mulf %54, %66 : vector<4x32xf32>
    %68 = arith.addf %63, %67 : vector<4x32xf32>
    %69 = math.tanh %68 : vector<4x32xf32>
    %cst_19 = arith.constant 1.000000e+00 : f32
    %70 = vector.broadcast %cst_19 : f32 to vector<4x32xf32>
    %71 = arith.subf %70, %62 : vector<4x32xf32>
    %72 = arith.mulf %71, %69 : vector<4x32xf32>
    %73 = arith.mulf %62, %39 : vector<4x32xf32>
    %74 = arith.addf %72, %73 : vector<4x32xf32>
    %c2_i32 = arith.constant 2 : i32
    %75 = arith.truncf %74 : vector<4x32xf32> to vector<4x32xbf16>
    %c0_20 = arith.constant 0 : index
    %c0_21 = arith.constant 0 : index
    %76 = vector.load %arg3[%c0_20, %c0_21] : memref<32x96xbf16, #tpu.memory_space<vmem>>, vector<32x96xbf16>
    %cst_22 = arith.constant dense<0.000000e+00> : vector<4x96xf32>
    %77 = tpu.matmul %75, %76, %cst_22 {dimension_numbers = #tpu.dot_dimension_numbers<[1], [0], [0], [1], [0, 0, 1, 1], [], []>} : vector<4x32xbf16>, vector<32x96xbf16>, vector<4x96xf32> -> vector<4x96xf32>
    %78 = arith.index_cast %c2_i32 : i32 to index
    %c0_23 = arith.constant 0 : index
    %c0_24 = arith.constant 0 : index
    %79 = vector.load %arg2[%78, %c0_23, %c0_24] : memref<8x4x96xbf16, #tpu.memory_space<vmem>>, vector<1x4x96xbf16>
    %80 = vector.shape_cast %79 : vector<1x4x96xbf16> to vector<4x96xbf16>
    %81 = arith.extf %80 : vector<4x96xbf16> to vector<4x96xf32>
    %82 = vector.extract_strided_slice %81 {offsets = [0, 0], sizes = [4, 32], strides = [1, 1]} : vector<4x96xf32> to vector<4x32xf32>
    %83 = vector.extract_strided_slice %77 {offsets = [0, 0], sizes = [4, 32], strides = [1, 1]} : vector<4x96xf32> to vector<4x32xf32>
    %84 = arith.addf %82, %83 : vector<4x32xf32>
    %85 = arith.negf %84 : vector<4x32xf32>
    %86 = math.exp %85 : vector<4x32xf32>
    %cst_25 = arith.constant 1.000000e+00 : f32
    %87 = vector.broadcast %cst_25 : f32 to vector<4x32xf32>
    %88 = arith.addf %87, %86 : vector<4x32xf32>
    %89 = arith.divf %87, %88 : vector<4x32xf32>
    %90 = vector.extract_strided_slice %81 {offsets = [0, 32], sizes = [4, 32], strides = [1, 1]} : vector<4x96xf32> to vector<4x32xf32>
    %91 = vector.extract_strided_slice %77 {offsets = [0, 32], sizes = [4, 32], strides = [1, 1]} : vector<4x96xf32> to vector<4x32xf32>
    %92 = arith.addf %90, %91 : vector<4x32xf32>
    %93 = arith.negf %92 : vector<4x32xf32>
    %94 = math.exp %93 : vector<4x32xf32>
    %cst_26 = arith.constant 1.000000e+00 : f32
    %95 = vector.broadcast %cst_26 : f32 to vector<4x32xf32>
    %96 = arith.addf %95, %94 : vector<4x32xf32>
    %97 = arith.divf %95, %96 : vector<4x32xf32>
    %98 = vector.extract_strided_slice %81 {offsets = [0, 64], sizes = [4, 32], strides = [1, 1]} : vector<4x96xf32> to vector<4x32xf32>
    %99 = vector.extract_strided_slice %77 {offsets = [0, 64], sizes = [4, 32], strides = [1, 1]} : vector<4x96xf32> to vector<4x32xf32>
    %100 = vector.broadcast %3 : vector<1x32xf32> to vector<4x32xf32>
    %101 = arith.addf %99, %100 : vector<4x32xf32>
    %102 = arith.mulf %89, %101 : vector<4x32xf32>
    %103 = arith.addf %98, %102 : vector<4x32xf32>
    %104 = math.tanh %103 : vector<4x32xf32>
    %cst_27 = arith.constant 1.000000e+00 : f32
    %105 = vector.broadcast %cst_27 : f32 to vector<4x32xf32>
    %106 = arith.subf %105, %97 : vector<4x32xf32>
    %107 = arith.mulf %106, %104 : vector<4x32xf32>
    %108 = arith.mulf %97, %74 : vector<4x32xf32>
    %109 = arith.addf %107, %108 : vector<4x32xf32>
    %c3_i32 = arith.constant 3 : i32
    %110 = arith.truncf %109 : vector<4x32xf32> to vector<4x32xbf16>
    %c0_28 = arith.constant 0 : index
    %c0_29 = arith.constant 0 : index
    %111 = vector.load %arg3[%c0_28, %c0_29] : memref<32x96xbf16, #tpu.memory_space<vmem>>, vector<32x96xbf16>
    %cst_30 = arith.constant dense<0.000000e+00> : vector<4x96xf32>
    %112 = tpu.matmul %110, %111, %cst_30 {dimension_numbers = #tpu.dot_dimension_numbers<[1], [0], [0], [1], [0, 0, 1, 1], [], []>} : vector<4x32xbf16>, vector<32x96xbf16>, vector<4x96xf32> -> vector<4x96xf32>
    %113 = arith.index_cast %c3_i32 : i32 to index
    %c0_31 = arith.constant 0 : index
    %c0_32 = arith.constant 0 : index
    %114 = vector.load %arg2[%113, %c0_31, %c0_32] : memref<8x4x96xbf16, #tpu.memory_space<vmem>>, vector<1x4x96xbf16>
    %115 = vector.shape_cast %114 : vector<1x4x96xbf16> to vector<4x96xbf16>
    %116 = arith.extf %115 : vector<4x96xbf16> to vector<4x96xf32>
    %117 = vector.extract_strided_slice %116 {offsets = [0, 0], sizes = [4, 32], strides = [1, 1]} : vector<4x96xf32> to vector<4x32xf32>
    %118 = vector.extract_strided_slice %112 {offsets = [0, 0], sizes = [4, 32], strides = [1, 1]} : vector<4x96xf32> to vector<4x32xf32>
    %119 = arith.addf %117, %118 : vector<4x32xf32>
    %120 = arith.negf %119 : vector<4x32xf32>
    %121 = math.exp %120 : vector<4x32xf32>
    %cst_33 = arith.constant 1.000000e+00 : f32
    %122 = vector.broadcast %cst_33 : f32 to vector<4x32xf32>
    %123 = arith.addf %122, %121 : vector<4x32xf32>
    %124 = arith.divf %122, %123 : vector<4x32xf32>
    %125 = vector.extract_strided_slice %116 {offsets = [0, 32], sizes = [4, 32], strides = [1, 1]} : vector<4x96xf32> to vector<4x32xf32>
    %126 = vector.extract_strided_slice %112 {offsets = [0, 32], sizes = [4, 32], strides = [1, 1]} : vector<4x96xf32> to vector<4x32xf32>
    %127 = arith.addf %125, %126 : vector<4x32xf32>
    %128 = arith.negf %127 : vector<4x32xf32>
    %129 = math.exp %128 : vector<4x32xf32>
    %cst_34 = arith.constant 1.000000e+00 : f32
    %130 = vector.broadcast %cst_34 : f32 to vector<4x32xf32>
    %131 = arith.addf %130, %129 : vector<4x32xf32>
    %132 = arith.divf %130, %131 : vector<4x32xf32>
    %133 = vector.extract_strided_slice %116 {offsets = [0, 64], sizes = [4, 32], strides = [1, 1]} : vector<4x96xf32> to vector<4x32xf32>
    %134 = vector.extract_strided_slice %112 {offsets = [0, 64], sizes = [4, 32], strides = [1, 1]} : vector<4x96xf32> to vector<4x32xf32>
    %135 = vector.broadcast %3 : vector<1x32xf32> to vector<4x32xf32>
    %136 = arith.addf %134, %135 : vector<4x32xf32>
    %137 = arith.mulf %124, %136 : vector<4x32xf32>
    %138 = arith.addf %133, %137 : vector<4x32xf32>
    %139 = math.tanh %138 : vector<4x32xf32>
    %cst_35 = arith.constant 1.000000e+00 : f32
    %140 = vector.broadcast %cst_35 : f32 to vector<4x32xf32>
    %141 = arith.subf %140, %132 : vector<4x32xf32>
    %142 = arith.mulf %141, %139 : vector<4x32xf32>
    %143 = arith.mulf %132, %109 : vector<4x32xf32>
    %144 = arith.addf %142, %143 : vector<4x32xf32>
    %c4_i32 = arith.constant 4 : i32
    %145 = arith.truncf %144 : vector<4x32xf32> to vector<4x32xbf16>
    %c0_36 = arith.constant 0 : index
    %c0_37 = arith.constant 0 : index
    %146 = vector.load %arg3[%c0_36, %c0_37] : memref<32x96xbf16, #tpu.memory_space<vmem>>, vector<32x96xbf16>
    %cst_38 = arith.constant dense<0.000000e+00> : vector<4x96xf32>
    %147 = tpu.matmul %145, %146, %cst_38 {dimension_numbers = #tpu.dot_dimension_numbers<[1], [0], [0], [1], [0, 0, 1, 1], [], []>} : vector<4x32xbf16>, vector<32x96xbf16>, vector<4x96xf32> -> vector<4x96xf32>
    %148 = arith.index_cast %c4_i32 : i32 to index
    %c0_39 = arith.constant 0 : index
    %c0_40 = arith.constant 0 : index
    %149 = vector.load %arg2[%148, %c0_39, %c0_40] : memref<8x4x96xbf16, #tpu.memory_space<vmem>>, vector<1x4x96xbf16>
    %150 = vector.shape_cast %149 : vector<1x4x96xbf16> to vector<4x96xbf16>
    %151 = arith.extf %150 : vector<4x96xbf16> to vector<4x96xf32>
    %152 = vector.extract_strided_slice %151 {offsets = [0, 0], sizes = [4, 32], strides = [1, 1]} : vector<4x96xf32> to vector<4x32xf32>
    %153 = vector.extract_strided_slice %147 {offsets = [0, 0], sizes = [4, 32], strides = [1, 1]} : vector<4x96xf32> to vector<4x32xf32>
    %154 = arith.addf %152, %153 : vector<4x32xf32>
    %155 = arith.negf %154 : vector<4x32xf32>
    %156 = math.exp %155 : vector<4x32xf32>
    %cst_41 = arith.constant 1.000000e+00 : f32
    %157 = vector.broadcast %cst_41 : f32 to vector<4x32xf32>
    %158 = arith.addf %157, %156 : vector<4x32xf32>
    %159 = arith.divf %157, %158 : vector<4x32xf32>
    %160 = vector.extract_strided_slice %151 {offsets = [0, 32], sizes = [4, 32], strides = [1, 1]} : vector<4x96xf32> to vector<4x32xf32>
    %161 = vector.extract_strided_slice %147 {offsets = [0, 32], sizes = [4, 32], strides = [1, 1]} : vector<4x96xf32> to vector<4x32xf32>
    %162 = arith.addf %160, %161 : vector<4x32xf32>
    %163 = arith.negf %162 : vector<4x32xf32>
    %164 = math.exp %163 : vector<4x32xf32>
    %cst_42 = arith.constant 1.000000e+00 : f32
    %165 = vector.broadcast %cst_42 : f32 to vector<4x32xf32>
    %166 = arith.addf %165, %164 : vector<4x32xf32>
    %167 = arith.divf %165, %166 : vector<4x32xf32>
    %168 = vector.extract_strided_slice %151 {offsets = [0, 64], sizes = [4, 32], strides = [1, 1]} : vector<4x96xf32> to vector<4x32xf32>
    %169 = vector.extract_strided_slice %147 {offsets = [0, 64], sizes = [4, 32], strides = [1, 1]} : vector<4x96xf32> to vector<4x32xf32>
    %170 = vector.broadcast %3 : vector<1x32xf32> to vector<4x32xf32>
    %171 = arith.addf %169, %170 : vector<4x32xf32>
    %172 = arith.mulf %159, %171 : vector<4x32xf32>
    %173 = arith.addf %168, %172 : vector<4x32xf32>
    %174 = math.tanh %173 : vector<4x32xf32>
    %cst_43 = arith.constant 1.000000e+00 : f32
    %175 = vector.broadcast %cst_43 : f32 to vector<4x32xf32>
    %176 = arith.subf %175, %167 : vector<4x32xf32>
    %177 = arith.mulf %176, %174 : vector<4x32xf32>
    %178 = arith.mulf %167, %144 : vector<4x32xf32>
    %179 = arith.addf %177, %178 : vector<4x32xf32>
    %c5_i32 = arith.constant 5 : i32
    %180 = arith.truncf %179 : vector<4x32xf32> to vector<4x32xbf16>
    %c0_44 = arith.constant 0 : index
    %c0_45 = arith.constant 0 : index
    %181 = vector.load %arg3[%c0_44, %c0_45] : memref<32x96xbf16, #tpu.memory_space<vmem>>, vector<32x96xbf16>
    %cst_46 = arith.constant dense<0.000000e+00> : vector<4x96xf32>
    %182 = tpu.matmul %180, %181, %cst_46 {dimension_numbers = #tpu.dot_dimension_numbers<[1], [0], [0], [1], [0, 0, 1, 1], [], []>} : vector<4x32xbf16>, vector<32x96xbf16>, vector<4x96xf32> -> vector<4x96xf32>
    %183 = arith.index_cast %c5_i32 : i32 to index
    %c0_47 = arith.constant 0 : index
    %c0_48 = arith.constant 0 : index
    %184 = vector.load %arg2[%183, %c0_47, %c0_48] : memref<8x4x96xbf16, #tpu.memory_space<vmem>>, vector<1x4x96xbf16>
    %185 = vector.shape_cast %184 : vector<1x4x96xbf16> to vector<4x96xbf16>
    %186 = arith.extf %185 : vector<4x96xbf16> to vector<4x96xf32>
    %187 = vector.extract_strided_slice %186 {offsets = [0, 0], sizes = [4, 32], strides = [1, 1]} : vector<4x96xf32> to vector<4x32xf32>
    %188 = vector.extract_strided_slice %182 {offsets = [0, 0], sizes = [4, 32], strides = [1, 1]} : vector<4x96xf32> to vector<4x32xf32>
    %189 = arith.addf %187, %188 : vector<4x32xf32>
    %190 = arith.negf %189 : vector<4x32xf32>
    %191 = math.exp %190 : vector<4x32xf32>
    %cst_49 = arith.constant 1.000000e+00 : f32
    %192 = vector.broadcast %cst_49 : f32 to vector<4x32xf32>
    %193 = arith.addf %192, %191 : vector<4x32xf32>
    %194 = arith.divf %192, %193 : vector<4x32xf32>
    %195 = vector.extract_strided_slice %186 {offsets = [0, 32], sizes = [4, 32], strides = [1, 1]} : vector<4x96xf32> to vector<4x32xf32>
    %196 = vector.extract_strided_slice %182 {offsets = [0, 32], sizes = [4, 32], strides = [1, 1]} : vector<4x96xf32> to vector<4x32xf32>
    %197 = arith.addf %195, %196 : vector<4x32xf32>
    %198 = arith.negf %197 : vector<4x32xf32>
    %199 = math.exp %198 : vector<4x32xf32>
    %cst_50 = arith.constant 1.000000e+00 : f32
    %200 = vector.broadcast %cst_50 : f32 to vector<4x32xf32>
    %201 = arith.addf %200, %199 : vector<4x32xf32>
    %202 = arith.divf %200, %201 : vector<4x32xf32>
    %203 = vector.extract_strided_slice %186 {offsets = [0, 64], sizes = [4, 32], strides = [1, 1]} : vector<4x96xf32> to vector<4x32xf32>
    %204 = vector.extract_strided_slice %182 {offsets = [0, 64], sizes = [4, 32], strides = [1, 1]} : vector<4x96xf32> to vector<4x32xf32>
    %205 = vector.broadcast %3 : vector<1x32xf32> to vector<4x32xf32>
    %206 = arith.addf %204, %205 : vector<4x32xf32>
    %207 = arith.mulf %194, %206 : vector<4x32xf32>
    %208 = arith.addf %203, %207 : vector<4x32xf32>
    %209 = math.tanh %208 : vector<4x32xf32>
    %cst_51 = arith.constant 1.000000e+00 : f32
    %210 = vector.broadcast %cst_51 : f32 to vector<4x32xf32>
    %211 = arith.subf %210, %202 : vector<4x32xf32>
    %212 = arith.mulf %211, %209 : vector<4x32xf32>
    %213 = arith.mulf %202, %179 : vector<4x32xf32>
    %214 = arith.addf %212, %213 : vector<4x32xf32>
    %c6_i32 = arith.constant 6 : i32
    %215 = arith.truncf %214 : vector<4x32xf32> to vector<4x32xbf16>
    %c0_52 = arith.constant 0 : index
    %c0_53 = arith.constant 0 : index
    %216 = vector.load %arg3[%c0_52, %c0_53] : memref<32x96xbf16, #tpu.memory_space<vmem>>, vector<32x96xbf16>
    %cst_54 = arith.constant dense<0.000000e+00> : vector<4x96xf32>
    %217 = tpu.matmul %215, %216, %cst_54 {dimension_numbers = #tpu.dot_dimension_numbers<[1], [0], [0], [1], [0, 0, 1, 1], [], []>} : vector<4x32xbf16>, vector<32x96xbf16>, vector<4x96xf32> -> vector<4x96xf32>
    %218 = arith.index_cast %c6_i32 : i32 to index
    %c0_55 = arith.constant 0 : index
    %c0_56 = arith.constant 0 : index
    %219 = vector.load %arg2[%218, %c0_55, %c0_56] : memref<8x4x96xbf16, #tpu.memory_space<vmem>>, vector<1x4x96xbf16>
    %220 = vector.shape_cast %219 : vector<1x4x96xbf16> to vector<4x96xbf16>
    %221 = arith.extf %220 : vector<4x96xbf16> to vector<4x96xf32>
    %222 = vector.extract_strided_slice %221 {offsets = [0, 0], sizes = [4, 32], strides = [1, 1]} : vector<4x96xf32> to vector<4x32xf32>
    %223 = vector.extract_strided_slice %217 {offsets = [0, 0], sizes = [4, 32], strides = [1, 1]} : vector<4x96xf32> to vector<4x32xf32>
    %224 = arith.addf %222, %223 : vector<4x32xf32>
    %225 = arith.negf %224 : vector<4x32xf32>
    %226 = math.exp %225 : vector<4x32xf32>
    %cst_57 = arith.constant 1.000000e+00 : f32
    %227 = vector.broadcast %cst_57 : f32 to vector<4x32xf32>
    %228 = arith.addf %227, %226 : vector<4x32xf32>
    %229 = arith.divf %227, %228 : vector<4x32xf32>
    %230 = vector.extract_strided_slice %221 {offsets = [0, 32], sizes = [4, 32], strides = [1, 1]} : vector<4x96xf32> to vector<4x32xf32>
    %231 = vector.extract_strided_slice %217 {offsets = [0, 32], sizes = [4, 32], strides = [1, 1]} : vector<4x96xf32> to vector<4x32xf32>
    %232 = arith.addf %230, %231 : vector<4x32xf32>
    %233 = arith.negf %232 : vector<4x32xf32>
    %234 = math.exp %233 : vector<4x32xf32>
    %cst_58 = arith.constant 1.000000e+00 : f32
    %235 = vector.broadcast %cst_58 : f32 to vector<4x32xf32>
    %236 = arith.addf %235, %234 : vector<4x32xf32>
    %237 = arith.divf %235, %236 : vector<4x32xf32>
    %238 = vector.extract_strided_slice %221 {offsets = [0, 64], sizes = [4, 32], strides = [1, 1]} : vector<4x96xf32> to vector<4x32xf32>
    %239 = vector.extract_strided_slice %217 {offsets = [0, 64], sizes = [4, 32], strides = [1, 1]} : vector<4x96xf32> to vector<4x32xf32>
    %240 = vector.broadcast %3 : vector<1x32xf32> to vector<4x32xf32>
    %241 = arith.addf %239, %240 : vector<4x32xf32>
    %242 = arith.mulf %229, %241 : vector<4x32xf32>
    %243 = arith.addf %238, %242 : vector<4x32xf32>
    %244 = math.tanh %243 : vector<4x32xf32>
    %cst_59 = arith.constant 1.000000e+00 : f32
    %245 = vector.broadcast %cst_59 : f32 to vector<4x32xf32>
    %246 = arith.subf %245, %237 : vector<4x32xf32>
    %247 = arith.mulf %246, %244 : vector<4x32xf32>
    %248 = arith.mulf %237, %214 : vector<4x32xf32>
    %249 = arith.addf %247, %248 : vector<4x32xf32>
    %c7_i32 = arith.constant 7 : i32
    %250 = arith.truncf %249 : vector<4x32xf32> to vector<4x32xbf16>
    %c0_60 = arith.constant 0 : index
    %c0_61 = arith.constant 0 : index
    %251 = vector.load %arg3[%c0_60, %c0_61] : memref<32x96xbf16, #tpu.memory_space<vmem>>, vector<32x96xbf16>
    %cst_62 = arith.constant dense<0.000000e+00> : vector<4x96xf32>
    %252 = tpu.matmul %250, %251, %cst_62 {dimension_numbers = #tpu.dot_dimension_numbers<[1], [0], [0], [1], [0, 0, 1, 1], [], []>} : vector<4x32xbf16>, vector<32x96xbf16>, vector<4x96xf32> -> vector<4x96xf32>
    %253 = arith.index_cast %c7_i32 : i32 to index
    %c0_63 = arith.constant 0 : index
    %c0_64 = arith.constant 0 : index
    %254 = vector.load %arg2[%253, %c0_63, %c0_64] : memref<8x4x96xbf16, #tpu.memory_space<vmem>>, vector<1x4x96xbf16>
    %255 = vector.shape_cast %254 : vector<1x4x96xbf16> to vector<4x96xbf16>
    %256 = arith.extf %255 : vector<4x96xbf16> to vector<4x96xf32>
    %257 = vector.extract_strided_slice %256 {offsets = [0, 0], sizes = [4, 32], strides = [1, 1]} : vector<4x96xf32> to vector<4x32xf32>
    %258 = vector.extract_strided_slice %252 {offsets = [0, 0], sizes = [4, 32], strides = [1, 1]} : vector<4x96xf32> to vector<4x32xf32>
    %259 = arith.addf %257, %258 : vector<4x32xf32>
    %260 = arith.negf %259 : vector<4x32xf32>
    %261 = math.exp %260 : vector<4x32xf32>
    %cst_65 = arith.constant 1.000000e+00 : f32
    %262 = vector.broadcast %cst_65 : f32 to vector<4x32xf32>
    %263 = arith.addf %262, %261 : vector<4x32xf32>
    %264 = arith.divf %262, %263 : vector<4x32xf32>
    %265 = vector.extract_strided_slice %256 {offsets = [0, 32], sizes = [4, 32], strides = [1, 1]} : vector<4x96xf32> to vector<4x32xf32>
    %266 = vector.extract_strided_slice %252 {offsets = [0, 32], sizes = [4, 32], strides = [1, 1]} : vector<4x96xf32> to vector<4x32xf32>
    %267 = arith.addf %265, %266 : vector<4x32xf32>
    %268 = arith.negf %267 : vector<4x32xf32>
    %269 = math.exp %268 : vector<4x32xf32>
    %cst_66 = arith.constant 1.000000e+00 : f32
    %270 = vector.broadcast %cst_66 : f32 to vector<4x32xf32>
    %271 = arith.addf %270, %269 : vector<4x32xf32>
    %272 = arith.divf %270, %271 : vector<4x32xf32>
    %273 = vector.extract_strided_slice %256 {offsets = [0, 64], sizes = [4, 32], strides = [1, 1]} : vector<4x96xf32> to vector<4x32xf32>
    %274 = vector.extract_strided_slice %252 {offsets = [0, 64], sizes = [4, 32], strides = [1, 1]} : vector<4x96xf32> to vector<4x32xf32>
    %275 = vector.broadcast %3 : vector<1x32xf32> to vector<4x32xf32>
    %276 = arith.addf %274, %275 : vector<4x32xf32>
    %277 = arith.mulf %264, %276 : vector<4x32xf32>
    %278 = arith.addf %273, %277 : vector<4x32xf32>
    %279 = math.tanh %278 : vector<4x32xf32>
    %cst_67 = arith.constant 1.000000e+00 : f32
    %280 = vector.broadcast %cst_67 : f32 to vector<4x32xf32>
    %281 = arith.subf %280, %272 : vector<4x32xf32>
    %282 = arith.mulf %281, %279 : vector<4x32xf32>
    %283 = arith.mulf %272, %249 : vector<4x32xf32>
    %284 = arith.addf %282, %283 : vector<4x32xf32>
    %c8_i32 = arith.constant 8 : i32
    %c0_68 = arith.constant 0 : index
    %c0_69 = arith.constant 0 : index
    %285 = vector.load %arg10[%c0_68, %c0_69] : memref<4x32xf32, #tpu.memory_space<vmem>>, vector<4x32xf32>
    tpu.vector_store %arg10[%c0_68, %c0_69], %284 {strides = array<i32>} : memref<4x32xf32, #tpu.memory_space<vmem>>, vector<4x32xf32>,
    %c0_i32_70 = arith.constant 0 : i32
    %286 = arith.cmpi eq, %arg1, %c0_i32_70 : i32
    %287 = arith.extui %286 : i1 to i32
    %c0_i32_71 = arith.constant 0 : i32
    %288 = arith.cmpi ne, %287, %c0_i32_71 : i32
    scf.if %288 {
      %289 = arith.truncf %284 : vector<4x32xf32> to vector<4x32xbf16>
      %c0_72 = arith.constant 0 : index
      %c0_73 = arith.constant 0 : index
      %290 = vector.load %arg5[%c0_72, %c0_73] : memref<32x32xbf16, #tpu.memory_space<vmem>>, vector<32x32xbf16>
      %cst_74 = arith.constant dense<0.000000e+00> : vector<4x32xf32>
      %291 = tpu.matmul %289, %290, %cst_74 {dimension_numbers = #tpu.dot_dimension_numbers<[1], [0], [0], [1], [0, 0, 1, 1], [], []>} : vector<4x32xbf16>, vector<32x32xbf16>, vector<4x32xf32> -> vector<4x32xf32>
      %c0_75 = arith.constant 0 : index
      %c0_76 = arith.constant 0 : index
      %292 = vector.load %arg6[%c0_75, %c0_76] : memref<1x32xf32, #tpu.memory_space<vmem>>, vector<1x32xf32>
      %293 = vector.broadcast %292 : vector<1x32xf32> to vector<4x32xf32>
      %294 = arith.addf %291, %293 : vector<4x32xf32>
      %cst_77 = arith.constant 0.000000e+00 : f32
      %295 = vector.broadcast %cst_77 : f32 to vector<4x32xf32>
      %296 = arith.maximumf %294, %295 : vector<4x32xf32>
      %297 = arith.truncf %296 : vector<4x32xf32> to vector<4x32xbf16>
      %c0_78 = arith.constant 0 : index
      %c0_79 = arith.constant 0 : index
      %298 = vector.load %arg7[%c0_78, %c0_79] : memref<32x3xbf16, #tpu.memory_space<vmem>>, vector<32x3xbf16>
      %cst_80 = arith.constant dense<0.000000e+00> : vector<4x3xf32>
      %299 = tpu.matmul %297, %298, %cst_80 {dimension_numbers = #tpu.dot_dimension_numbers<[1], [0], [0], [1], [0, 0, 1, 1], [], []>} : vector<4x32xbf16>, vector<32x3xbf16>, vector<4x3xf32> -> vector<4x3xf32>
      %c0_81 = arith.constant 0 : index
      %c0_82 = arith.constant 0 : index
      %300 = vector.load %arg8[%c0_81, %c0_82] : memref<1x3xf32, #tpu.memory_space<vmem>>, vector<1x3xf32>
      %301 = vector.broadcast %300 : vector<1x3xf32> to vector<4x3xf32>
      %302 = arith.addf %299, %301 : vector<4x3xf32>
      %c0_83 = arith.constant 0 : index
      %c0_84 = arith.constant 0 : index
      %303 = vector.load %arg9[%c0_83, %c0_84] : memref<4x3xf32, #tpu.memory_space<vmem>>, vector<4x3xf32>
      tpu.vector_store %arg9[%c0_83, %c0_84], %302 {strides = array<i32>} : memref<4x3xf32, #tpu.memory_space<vmem>>, vector<4x3xf32>,
    } else {
    }
    return
  }
  func.func @transform_0(%arg0: i32, %arg1: i32) -> (i32, i32, i32) {
    %c0_i32 = arith.constant 0 : i32
    %c0_i32_0 = arith.constant 0 : i32
    return %arg1, %arg0, %c0_i32 : i32, i32, i32
  }
  func.func @transform_1(%arg0: i32, %arg1: i32) -> (i32, i32) {
    %c0_i32 = arith.constant 0 : i32
    %c0_i32_0 = arith.constant 0 : i32
    %c0_i32_1 = arith.constant 0 : i32
    return %c0_i32, %c0_i32_0 : i32, i32
  }
  func.func @transform_2(%arg0: i32, %arg1: i32) -> (i32, i32) {
    %c0_i32 = arith.constant 0 : i32
    %c0_i32_0 = arith.constant 0 : i32
    %c0_i32_1 = arith.constant 0 : i32
    return %c0_i32, %c0_i32_0 : i32, i32
  }
  func.func @transform_3(%arg0: i32, %arg1: i32) -> (i32, i32) {
    %c0_i32 = arith.constant 0 : i32
    %c0_i32_0 = arith.constant 0 : i32
    %c0_i32_1 = arith.constant 0 : i32
    return %c0_i32, %c0_i32_0 : i32, i32
  }
  func.func @transform_4(%arg0: i32, %arg1: i32) -> (i32, i32) {
    %c0_i32 = arith.constant 0 : i32
    %c0_i32_0 = arith.constant 0 : i32
    %c0_i32_1 = arith.constant 0 : i32
    return %c0_i32, %c0_i32_0 : i32, i32
  }
  func.func @transform_5(%arg0: i32, %arg1: i32) -> (i32, i32) {
    %c0_i32 = arith.constant 0 : i32
    %c0_i32_0 = arith.constant 0 : i32
    %c0_i32_1 = arith.constant 0 : i32
    return %c0_i32, %c0_i32_0 : i32, i32
  }
  func.func @transform_6(%arg0: i32, %arg1: i32) -> (i32, i32) {
    %c0_i32 = arith.constant 0 : i32
    %c0_i32_0 = arith.constant 0 : i32
    %c0_i32_1 = arith.constant 0 : i32
    return %c0_i32, %c0_i32_0 : i32, i32
  }
  func.func @transform_7(%arg0: i32, %arg1: i32) -> (i32, i32) {
    %c0_i32 = arith.constant 0 : i32
    %c0_i32_0 = arith.constant 0 : i32
    return %arg0, %c0_i32 : i32, i32
  }
}

</mosaic_0001>

<bundles_post_ra>
// kernel: gru_model_forward.6
= control target key start
LH: loop header
LB: loop body
LE: loop exit
PB: predicated region body
PF: predicated region fallthrough
CT: control target
= control target key end

     0   :  { %vm52_vm0 = vcmask 261120   ;;  %vm124_vm1 = vcmask 781312   ;;  %s211_s1 = inlined_call_operand.vmem [shape: bf16[32,96], index: 1, kind: input, shape index: {}]   ;;  %s212_s0 = inlined_call_operand.vmem [shape: bf16[32,32], index: 0, kind: input, shape index: {}]   ;;  %s213_s2 = inlined_call_operand.vmem [shape: f32[1,96], index: 2, kind: input, shape index: {}]   ;;  %s214_s3 = inlined_call_operand.vmem [shape: bf16[32,96], index: 3, kind: output, shape index: {}]  }
   0x1   :  { %v160_v0 = vld [vmem:[%s211_s1] sm:$0xff]   ;;  %v161_v1 = vld [vmem:[%s211_s1 + $0x8] sm:$0xff]  }
   0x2   :  { %152 = vmatprep.subr.bf16.mxu0 %v160_v0  ;;  %v162_v2 = vld [vmem:[%s212_s0] sm:$0xff]   ;;  %v163_v3 = vld [vmem:[%s212_s0 + $0x8] sm:$0xff]  }
   0x3   :  { %153 = vmatpush3.bf16.msra.mxu0 %v160_v0  ;;  %156 = vmatprep.mubr.msk.bf16.mxu0 %vm52_vm0, %v162_v2  ;;  %v133_v4 = vld [vmem:[%s213_s2] ss:$0 sm:$0xff] }
   0x4   :  { %154 = vmatprep.subr.bf16.mxu0 %v161_v1 }
   0x7   :  { %155 = vmatpush3.bf16.msra.mxu0 %v161_v1 }
   0xa   :  { %157 = vmatmul.mubr.msk.bf16.vlgmr.msra.gmra.mrb[0].mxu0 %vm52_vm0, %v163_v3 }
  0xdd   :  { %v158_v5 = vpop.f32.mrb[0].mxu0 }
  0xde   :  { %v102_v6 = vadd.f32 %v158_v5, %v133_v4  ;;  %v93_v7 = vpop.f32.mrb[1].mxu0 }
  0xdf   :  { %v94_v8 = vadd.f32 %v133_v4, %v93_v7  ;;  %v159_v9 = vpop.f32.mrb[2].mxu0 }
  0xe0   :  { %v146_v10 = vpack.c.bf16 %v102_v6, %v102_v6  ;;  %v105_v11 = vadd.f32 %v159_v9, %v133_v4  ;;  %v96_v12 = vpop.f32.mrb[3].mxu0 }
  0xe1   :  { %v144_v13 = vpack.c.bf16 %v94_v8, %v94_v8  ;;  %v97_v14 = vadd.f32 %v133_v4, %v96_v12 }
  0xe2   :  { %127 = vst.msk [vmem:[%s214_s3 + $0x8] sm:$0xf] %vm124_vm1, %v146_v10  ;;  %v147_v15 = vpack.c.bf16 %v105_v11, %v105_v11 }
  0xe3   :  { %125 = vst.msk [vmem:[%s214_s3] sm:$0xf] %vm124_vm1, %v144_v13  ;;  %v145_v16 = vpack.c.bf16 %v97_v14, %v97_v14 }
  0xe4   :  { %128 = vst.msk [vmem:[%s214_s3 + $0xc] sm:$0xf] %vm124_vm1, %v147_v15 }
  0xe5   :  { %126 = vst.msk [vmem:[%s214_s3 + $0x4] sm:$0xf] %vm124_vm1, %v145_v16 }

// kernel: gru_model_forward.4
= control target key start
LH: loop header
LB: loop body
LE: loop exit
PB: predicated region body
PF: predicated region fallthrough
CT: control target
= control target key end

     0   :  { %8 = vsyncpa [#allocation3], 0  ;;  %s193_s12 = smov [#allocation2]   ;;  %s246_s0 = inlined_call_operand.hbm [shape: bf16[32,16], index: 0, kind: input, shape index: {}]   ;;  %s247_s1 = inlined_call_operand.vmem [shape: bf16[16,96], index: 1, kind: input, shape index: {}]   ;;  %s248_s2 = inlined_call_operand.vmem [shape: f32[1,96], index: 2, kind: input, shape index: {}]   ;;  %s249_s3 = inlined_call_operand.vmem [shape: bf16[32,96], index: 3, kind: output, shape index: {}]  }
   0x1   :  { %s14_s13 = sshll.u32 %s193_s12, 4  ;;  %s169_s16 = scalar_lea.hbm %s246_s0, 256  ;;  %s15_s13 = int_to_ptr.vmem [resolvable:$true] %s14_s13 }
   0x2   :  { %p170_p0 = scmp.ne.s32.totalorder %s246_s0, %s169_s16  ;;  %p173_p1 = scmp.lt.u32.totalorder %s169_s16, %s246_s0 }
   0x4   :  { %p175_p2 = pnand %p173_p1, %p170_p0 }
   0x6   :  { %178 = shalt.err (!%p175_p2)
}
   0x7   :  { %s179_s21 = scalar_lea.vmem %s15_s13, 256  ;;  %p184_p4 = scmp.lt.s32.totalorder %s15_s13, %s15_s13 }
   0x8   :  { %p180_p3 = scmp.ne.s32.totalorder %s15_s13, %s179_s21  ;;  %p185_p5 = scmp.lt.s32.totalorder %s179_s21, %s179_s21 }
   0xa   :  { %p186_p6 = por %p185_p5, %p184_p4 }
   0xc   :  { %p187_p7 = pnand %p186_p6, %p180_p3 }
   0xe   :  { %190 = shalt.err (!%p187_p7)
}
   0xf   :  { %s194_s22 = smov 64   ;;  %s195_s23 = smov 4  }
  0x10   :  { %20 = dma.hbm_to_vmem [thread:$0]  %s246_s0, 256, %s15_s13, [#allocation3], %s194_s22, %s194_s22, %s195_s23  }
  0x11   :  { %191 = dma.done.wait [#allocation3], 256  }
  0x12   :  { %192 = vsyncadd [#allocation3], 4294967040  ;;  %v166_v0 = vld [vmem:[%s247_s1] sm:$0xff]   ;;  %vm58_vm0 = vcmask 130048   ;;  %v168_v2 = vld [vmem:[#allocation2 + $0x8] sm:$0xff]   ;;  %vm130_vm1 = vcmask 781312  }
  0x13   :  { %v167_v1 = vld [vmem:[#allocation2] sm:$0xff]   ;;  %157 = vmatprep.subr.bf16.mxu0 %v166_v0 }
  0x14   :  { %158 = vmatpush3.bf16.msra.mxu0 %v166_v0  ;;  %159 = vmatprep.mubr.msk.bf16.mxu0 %vm58_vm0, %v167_v1  ;;  %v140_v3 = vld [vmem:[%s248_s2] ss:$0 sm:$0xff] }
  0x17   :  { %160 = vmatmul.mubr.msk.bf16.vlgmr.msra.gmra.mrb[0].mxu0 %vm58_vm0, %v168_v2 }
  0xea   :  { %v161_v4 = vpop.f32.mrb[0].mxu0 }
  0xeb   :  { %v108_v5 = vadd.f32 %v161_v4, %v140_v3  ;;  %v99_v6 = vpop.f32.mrb[1].mxu0 }
  0xec   :  { %v100_v7 = vadd.f32 %v140_v3, %v99_v6  ;;  %v162_v8 = vpop.f32.mrb[2].mxu0 }
  0xed   :  { %v152_v9 = vpack.c.bf16 %v108_v5, %v108_v5  ;;  %v111_v10 = vadd.f32 %v162_v8, %v140_v3  ;;  %v102_v11 = vpop.f32.mrb[3].mxu0 }
  0xee   :  { %v150_v12 = vpack.c.bf16 %v100_v7, %v100_v7  ;;  %v103_v13 = vadd.f32 %v140_v3, %v102_v11 }
  0xef   :  { %133 = vst.msk [vmem:[%s249_s3 + $0x8] sm:$0xf] %vm130_vm1, %v152_v9  ;;  %v153_v14 = vpack.c.bf16 %v111_v10, %v111_v10 }
  0xf0   :  { %131 = vst.msk [vmem:[%s249_s3] sm:$0xf] %vm130_vm1, %v150_v12  ;;  %v151_v15 = vpack.c.bf16 %v103_v13, %v103_v13 }
  0xf1   :  { %134 = vst.msk [vmem:[%s249_s3 + $0xc] sm:$0xf] %vm130_vm1, %v153_v14 }
  0xf2   :  { %132 = vst.msk [vmem:[%s249_s3 + $0x4] sm:$0xf] %vm130_vm1, %v151_v15 }
  0xf3   :  { %139 = vsyncpa [#allocation3], 1 }

// kernel: gru_model_forward.5
= control target key start
LH: loop header
LB: loop body
LE: loop exit
PB: predicated region body
PF: predicated region fallthrough
CT: control target
= control target key end

     0   :  { %vm19_vm0 = vcmask 257024   ;;  %v1089_v0 = vmov 0.0   ;;  %vm1090_vm1 = vmmov 0   ;;  %vm40_vm2 = vcmask 261120   ;;  %s1091_s18 = smov 64   ;;  %s1093_s25 = smov 96   ;;  %s1340_s1 = inlined_call_operand.vmem [shape: bf16[32,96], index: 1, kind: input, shape index: {}]   ;;  %s1341_s2 = inlined_call_operand.vmem [shape: f32[1,32], index: 2, kind: input, shape index: {}]   ;;  %s1342_s0 = inlined_call_operand.vmem [shape: bf16[8,4,96], index: 0, kind: input, shape index: {}]   ;;  %s1343_s3 = inlined_call_operand.vmem [shape: bf16[8,4,32], index: 3, kind: output, shape index: {}]  }
   0x1   :  { %955 = vmatprep.subr.bf16.mxu0 %v1089_v0  ;;  %v1025_v1 = vld [vmem:[%s1340_s1] sm:$0xff]   ;;  %959 = vmatprep.mubr.msk.bf16.mxu0 %vm1090_vm1, %v1089_v0  ;;  %20 = vst.msk [vmem:[#allocation2] sm:$0xf] %vm19_vm0, %v1089_v0  ;;  %v1026_v2 = vld [vmem:[%s1340_s1 + $0x8] sm:$0xff]   ;;  %vm137_vm3 = vcmask 254976  }
   0x2   :  { %963 = vmatprep.subr.bf16.mxu1 %v1089_v0  ;;  %967 = vmatprep.mubr.msk.bf16.mxu1 %vm1090_vm1, %v1089_v0  ;;  %v888_v3 = vld [vmem:[%s1341_s2] ss:$0 sm:$0xff]  ;;  %s1092_s2 = smov 32   ;;  %v1028_v24 = vld [vmem:[%s1340_s1 + $0x8] sm:$0xff]   ;;  %v892_v39 = vld [vmem:[%s1342_s0 + $0x2] sm:$0x3] }
   0x3   :  { %956 = vmatpush3.bf16.msra.mxu0 %v1025_v1  ;;  %98 = vrot.lane.b32.xlu0 %v888_v3, %s1091_s18  ;;  %v84_v12 = vld [vmem:[%s1342_s0] sm:$0x3]  ;;  %v202_v40 = vunpack.c.l.bf16 %v892_v39  ;;  %v1030_v51 = vld [vmem:[%s1340_s1 + $0x8] sm:$0xff]  }
   0x4   :  { %957 = vmatprep.subr.bf16.mxu0 %v1089_v0  ;;  %v85_v13 = vunpack.c.l.bf16 %v84_v12  ;;  %v1027_v23 = vld [vmem:[%s1340_s1] sm:$0xff]  }
   0x5   :  { %964 = vmatpush3.bf16.msra.mxu1 %v1027_v23  ;;  %v1029_v50 = vld [vmem:[%s1340_s1] sm:$0xff]  }
   0x6   :  { %965 = vmatprep.subr.bf16.mxu1 %v1089_v0 }
   0x7   :  { %958 = vmatpush3.bf16.msra.mxu0 %v1026_v2  ;;  %v898_v2 = vld [vmem:[%s1342_s0 + $0x4] sm:$0x3] }
   0x8   :  { %v22_v4 = vld [vmem:[#allocation2] sm:$0xf]  ;;  %971 = vmatprep.subr.bf16.mxu0 %v1089_v0  ;;  %v307_v3 = vunpack.c.l.bf16 %v898_v2 }
   0x9   :  { %v23_v5 = vpack.c.bf16 %v22_v4, %v22_v4  ;;  %966 = vmatpush3.bf16.msra.mxu1 %v1028_v24 }
   0xa   :  { %979 = vmatprep.subr.bf16.mxu1 %v1089_v0 }
   0xb   :  { %960 = vmatmul.mubr.msk.bf16.vlgmr.msra.gmra.mrb[0].mxu0 %vm40_vm2, %v23_v5 }
   0xc   :  { %975 = vmatprep.mubr.msk.bf16.mxu0 %vm1090_vm1, %v1089_v0  ;;  %972 = vmatpush3.bf16.msra.mxu0 %v1029_v50 }
   0xd   :  { %973 = vmatprep.subr.bf16.mxu0 %v1089_v0 }
  0x10   :  { %974 = vmatpush3.bf16.msra.mxu0 %v1030_v51 }
  0x11   :  { %987 = vmatprep.subr.bf16.mxu0 %v1089_v0 }
  0x75   :  { %v1138_v6 = vpop.permute.xlu0 %98 }
  0xde   :  { %v78_v7 = vpop.f32.mrb[0].mxu0 }
  0xdf   :  { %v101_v8 = vadd.f32 %v1138_v6, %v78_v7  ;;  %v961_v9 = vpop.f32.mrb[1].mxu0  ;;  %v86_v14 = vadd.f32 %v85_v13, %v78_v7 }
  0xe0   :  { %v81_v10 = vpop.f32.mrb[2].mxu0 }
  0xe1   :  { %103 = vrot.lane.b32.xlu0 %v101_v8, %s1091_s18  ;;  %v962_v11 = vpop.f32.mrb[3].mxu0  ;;  %v887_v15 = vmul.f32 -1.442695, %v86_v14  ;;  %v1031_v14 = vld [vmem:[%s1340_s1] sm:$0xff]  }
  0xe3   :  { %1041 = vpow2.f32 %v887_v15  ;;  %v1032_v15 = vld [vmem:[%s1340_s1 + $0x8] sm:$0xff]  }
  0xe5   :  { %120 = vrot.lane.b32.xlu0 %v22_v4, %s1092_s2 }
  0xed   :  { %v1042_v16 = vpop.eup %1041 }
  0xee   :  { %v90_v17 = vadd.f32 1.0, %v1042_v16 }
  0xf0   :  { %1043 = vrcp.f32 %v90_v17 }
  0xfa   :  { %v1044_v18 = vpop.eup %1043 }
  0xfb   :  { %v113_v27 = vsub.f32 1.0, %v1044_v18 }
 0x153   :  { %v104_v19 = vpop.permute.xlu0 %103 }
 0x154   :  { %v106_v20 = vmul.f32 %v1044_v18, %v104_v19 }
 0x156   :  { %108 = vrot.lane.b32.xlu1 %v106_v20, %s1091_s18 }
 0x157   :  { %v121_v26 = vpop.permute.xlu0 %120 }
 0x158   :  { %v123_v29 = vmul.f32 %v1044_v18, %v121_v26 }
 0x1c8   :  { %v109_v21 = vpop.permute.xlu1 %108 }
 0x1c9   :  { %v111_v22 = vadd.f32 %v109_v21, %v85_v13 }
 0x1cb   :  { %1045 = vtanh.f32 %v111_v22 }
 0x1d5   :  { %v1046_v25 = vpop.eup %1045 }
 0x1d6   :  { %115 = vrot.lane.b32.xlu1 %v1046_v25, %s1093_s25 }
 0x248   :  { %v116_v28 = vpop.permute.xlu1 %115 }
 0x249   :  { %v118_v30 = vmul.f32 %v116_v28, %v113_v27 }
 0x24b   :  { %v124_v31 = vadd.f32 %v123_v29, %v118_v30  ;;  %v904_v29 = vld [vmem:[%s1342_s0 + $0x6] sm:$0x3] }
 0x24c   :  { %v412_v30 = vunpack.c.l.bf16 %v904_v29 }
 0x24d   :  { %v1155_v32 = vpack.c.bf16 %v124_v31, %v124_v31 }
 0x24f   :  { %143 = vrot.lane.b32.xlu1 %v1155_v32, %s1093_s25 }
 0x2c1   :  { %v144_v33 = vpop.permute.xlu1 %143 }
 0x2c2   :  { %968 = vmatmul.mubr.msk.bf16.vlgmr.msra.gmra.mrb[0].mxu1 %vm40_vm2, %v144_v33 }
 0x2c3   :  { %983 = vmatprep.mubr.msk.bf16.mxu1 %vm1090_vm1, %v1089_v0  ;;  %980 = vmatpush3.bf16.msra.mxu1 %v1031_v14 }
 0x2c4   :  { %981 = vmatprep.subr.bf16.mxu1 %v1089_v0 }
 0x2c7   :  { %982 = vmatpush3.bf16.msra.mxu1 %v1032_v15 }
 0x2c8   :  { %995 = vmatprep.subr.bf16.mxu1 %v1089_v0 }
 0x395   :  { %v194_v34 = vpop.f32.mrb[0].mxu1 }
 0x396   :  { %v210_v35 = vadd.f32 %v194_v34, %v1138_v6  ;;  %v969_v36 = vpop.f32.mrb[1].mxu1  ;;  %v203_v41 = vadd.f32 %v202_v40, %v194_v34 }
 0x397   :  { %v197_v37 = vpop.f32.mrb[2].mxu1 }
 0x398   :  { %212 = vrot.lane.b32.xlu0 %v210_v35, %s1091_s18  ;;  %v970_v38 = vpop.f32.mrb[3].mxu1  ;;  %v893_v42 = vmul.f32 -1.442695, %v203_v41  ;;  %v1033_v41 = vld [vmem:[%s1340_s1] sm:$0xff]  }
 0x39a   :  { %1047 = vpow2.f32 %v893_v42  ;;  %v1034_v42 = vld [vmem:[%s1340_s1 + $0x8] sm:$0xff]  }
 0x3a4   :  { %v1048_v43 = vpop.eup %1047 }
 0x3a5   :  { %v207_v44 = vadd.f32 1.0, %v1048_v43 }
 0x3a7   :  { %1049 = vrcp.f32 %v207_v44 }
 0x3b1   :  { %v1050_v45 = vpop.eup %1049 }
 0x3b2   :  { %v222_v53 = vsub.f32 1.0, %v1050_v45  ;;  %v228_v55 = vmul.f32 %v1050_v45, %v124_v31 }
 0x40a   :  { %v213_v46 = vpop.permute.xlu0 %212 }
 0x40b   :  { %v215_v47 = vmul.f32 %v1050_v45, %v213_v46 }
 0x40d   :  { %217 = vrot.lane.b32.xlu1 %v215_v47, %s1091_s18 }
 0x47f   :  { %v218_v48 = vpop.permute.xlu1 %217 }
 0x480   :  { %v220_v49 = vadd.f32 %v218_v48, %v202_v40 }
 0x482   :  { %1051 = vtanh.f32 %v220_v49 }
 0x48c   :  { %v1052_v52 = vpop.eup %1051 }
 0x48d   :  { %224 = vrot.lane.b32.xlu0 %v1052_v52, %s1093_s25 }
 0x4ff   :  { %v225_v54 = vpop.permute.xlu0 %224 }
 0x500   :  { %v227_v56 = vmul.f32 %v225_v54, %v222_v53 }
 0x502   :  { %v229_v57 = vadd.f32 %v228_v55, %v227_v56  ;;  %v910_v56 = vld [vmem:[%s1342_s0 + $0x8] sm:$0x3] }
 0x504   :  { %v1177_v58 = vpack.c.bf16 %v229_v57, %v229_v57 }
 0x506   :  { %248 = vrot.lane.b32.xlu1 %v1177_v58, %s1093_s25 }
 0x578   :  { %v249_v59 = vpop.permute.xlu1 %248 }
 0x579   :  { %976 = vmatmul.mubr.msk.bf16.vlgmr.msra.gmra.mrb[4].mxu0 %vm40_vm2, %v249_v59 }
 0x57a   :  { %991 = vmatprep.mubr.msk.bf16.mxu0 %vm1090_vm1, %v1089_v0  ;;  %988 = vmatpush3.bf16.msra.mxu0 %v1033_v41 }
 0x57b   :  { %989 = vmatprep.subr.bf16.mxu0 %v1089_v0 }
 0x57e   :  { %990 = vmatpush3.bf16.msra.mxu0 %v1034_v42 }
 0x57f   :  { %1003 = vmatprep.subr.bf16.mxu0 %v1089_v0 }
 0x64c   :  { %v299_v60 = vpop.f32.mrb[4].mxu0 }
 0x64d   :  { %v315_v61 = vadd.f32 %v299_v60, %v1138_v6  ;;  %v977_v62 = vpop.f32.mrb[5].mxu0  ;;  %v308_v4 = vadd.f32 %v307_v3, %v299_v60 }
 0x64e   :  { %v302_v63 = vpop.f32.mrb[6].mxu0 }
 0x64f   :  { %317 = vrot.lane.b32.xlu0 %v315_v61, %s1091_s18  ;;  %v978_v1 = vpop.f32.mrb[7].mxu0  ;;  %v899_v5 = vmul.f32 -1.442695, %v308_v4 }
 0x651   :  { %1053 = vpow2.f32 %v899_v5  ;;  %v1035_v5 = vld [vmem:[%s1340_s1] sm:$0xff]  }
 0x65b   :  { %v1054_v7 = vpop.eup %1053 }
 0x65c   :  { %v312_v8 = vadd.f32 1.0, %v1054_v7  ;;  %v1036_v7 = vld [vmem:[%s1340_s1 + $0x8] sm:$0xff]  }
 0x65e   :  { %1055 = vrcp.f32 %v312_v8 }
 0x668   :  { %v1056_v9 = vpop.eup %1055 }
 0x669   :  { %v327_v17 = vsub.f32 1.0, %v1056_v9  ;;  %v333_v19 = vmul.f32 %v1056_v9, %v229_v57  ;;  %v517_v57 = vunpack.c.l.bf16 %v910_v56 }
 0x6c1   :  { %v318_v10 = vpop.permute.xlu0 %317 }
 0x6c2   :  { %v320_v11 = vmul.f32 %v1056_v9, %v318_v10 }
 0x6c4   :  { %322 = vrot.lane.b32.xlu1 %v320_v11, %s1091_s18 }
 0x736   :  { %v323_v12 = vpop.permute.xlu1 %322 }
 0x737   :  { %v325_v13 = vadd.f32 %v323_v12, %v307_v3 }
 0x739   :  { %1057 = vtanh.f32 %v325_v13 }
 0x743   :  { %v1058_v16 = vpop.eup %1057 }
 0x744   :  { %329 = vrot.lane.b32.xlu0 %v1058_v16, %s1093_s25 }
 0x7b6   :  { %v330_v18 = vpop.permute.xlu0 %329 }
 0x7b7   :  { %v332_v20 = vmul.f32 %v330_v18, %v327_v17 }
 0x7b9   :  { %v334_v21 = vadd.f32 %v333_v19, %v332_v20 }
 0x7bb   :  { %v1199_v22 = vpack.c.bf16 %v334_v21, %v334_v21 }
 0x7bd   :  { %353 = vrot.lane.b32.xlu1 %v1199_v22, %s1093_s25 }
 0x82f   :  { %v354_v23 = vpop.permute.xlu1 %353 }
 0x830   :  { %984 = vmatmul.mubr.msk.bf16.vlgmr.msra.gmra.mrb[4].mxu1 %vm40_vm2, %v354_v23 }
 0x831   :  { %999 = vmatprep.mubr.msk.bf16.mxu1 %vm1090_vm1, %v1089_v0  ;;  %996 = vmatpush3.bf16.msra.mxu1 %v1035_v5 }
 0x832   :  { %997 = vmatprep.subr.bf16.mxu1 %v1089_v0 }
 0x835   :  { %998 = vmatpush3.bf16.msra.mxu1 %v1036_v7 }
 0x836   :  { %1011 = vmatprep.subr.bf16.mxu1 %v1089_v0 }
 0x903   :  { %v404_v24 = vpop.f32.mrb[4].mxu1 }
 0x904   :  { %v420_v25 = vadd.f32 %v404_v24, %v1138_v6  ;;  %v985_v26 = vpop.f32.mrb[5].mxu1  ;;  %v413_v31 = vadd.f32 %v412_v30, %v404_v24 }
 0x905   :  { %v407_v27 = vpop.f32.mrb[6].mxu1 }
 0x906   :  { %422 = vrot.lane.b32.xlu0 %v420_v25, %s1091_s18  ;;  %v986_v28 = vpop.f32.mrb[7].mxu1  ;;  %v905_v33 = vmul.f32 -1.442695, %v413_v31 }
 0x908   :  { %1059 = vpow2.f32 %v905_v33 }
 0x912   :  { %v1060_v34 = vpop.eup %1059 }
 0x913   :  { %v417_v35 = vadd.f32 1.0, %v1060_v34  ;;  %v1037_v34 = vld [vmem:[%s1340_s1] sm:$0xff]  }
 0x915   :  { %1061 = vrcp.f32 %v417_v35  ;;  %v1038_v35 = vld [vmem:[%s1340_s1 + $0x8] sm:$0xff]  }
 0x91f   :  { %v1062_v36 = vpop.eup %1061 }
 0x920   :  { %v432_v44 = vsub.f32 1.0, %v1062_v36  ;;  %v438_v46 = vmul.f32 %v1062_v36, %v334_v21  ;;  %v916_v21 = vld [vmem:[%s1342_s0 + $0xa] sm:$0x3] }
 0x921   :  { %v622_v23 = vunpack.c.l.bf16 %v916_v21  ;;  %v1094_v21 = vmov 1983009808  }
 0x978   :  { %v423_v37 = vpop.permute.xlu0 %422 }
 0x979   :  { %v425_v38 = vmul.f32 %v1062_v36, %v423_v37 }
 0x97b   :  { %427 = vrot.lane.b32.xlu1 %v425_v38, %s1091_s18 }
 0x9ed   :  { %v428_v39 = vpop.permute.xlu1 %427 }
 0x9ee   :  { %v430_v40 = vadd.f32 %v428_v39, %v412_v30 }
 0x9f0   :  { %1063 = vtanh.f32 %v430_v40 }
 0x9fa   :  { %v1064_v43 = vpop.eup %1063 }
 0x9fb   :  { %434 = vrot.lane.b32.xlu0 %v1064_v43, %s1093_s25 }
 0xa6d   :  { %v435_v45 = vpop.permute.xlu0 %434 }
 0xa6e   :  { %v437_v47 = vmul.f32 %v435_v45, %v432_v44 }
 0xa70   :  { %v439_v48 = vadd.f32 %v438_v46, %v437_v47 }
 0xa72   :  { %v1221_v49 = vpack.c.bf16 %v439_v48, %v439_v48 }
 0xa74   :  { %458 = vrot.lane.b32.xlu1 %v1221_v49, %s1093_s25 }
 0xae6   :  { %v459_v50 = vpop.permute.xlu1 %458 }
 0xae7   :  { %992 = vmatmul.mubr.msk.bf16.vlgmr.msra.gmra.mrb[8].mxu0 %vm40_vm2, %v459_v50  ;;  %v922_v50 = vld [vmem:[%s1342_s0 + $0xc] sm:$0x3] }
 0xae8   :  { %1007 = vmatprep.mubr.msk.bf16.mxu0 %vm1090_vm1, %v1089_v0  ;;  %1004 = vmatpush3.bf16.msra.mxu0 %v1037_v34 }
 0xae9   :  { %1005 = vmatprep.subr.bf16.mxu0 %v1089_v0 }
 0xaec   :  { %1006 = vmatpush3.bf16.msra.mxu0 %v1038_v35 }
 0xbba   :  { %v509_v51 = vpop.f32.mrb[8].mxu0 }
 0xbbb   :  { %v525_v52 = vadd.f32 %v509_v51, %v1138_v6  ;;  %v993_v53 = vpop.f32.mrb[9].mxu0  ;;  %v518_v59 = vadd.f32 %v517_v57, %v509_v51  ;;  %v727_v51 = vunpack.c.l.bf16 %v922_v50 }
 0xbbc   :  { %v512_v54 = vpop.f32.mrb[10].mxu0 }
 0xbbd   :  { %527 = vrot.lane.b32.xlu0 %v525_v52, %s1091_s18  ;;  %v994_v55 = vpop.f32.mrb[11].mxu0  ;;  %v911_v60 = vmul.f32 -1.442695, %v518_v59 }
 0xbbf   :  { %1065 = vpow2.f32 %v911_v60 }
 0xbc9   :  { %v1066_v61 = vpop.eup %1065 }
 0xbca   :  { %v522_v62 = vadd.f32 1.0, %v1066_v61 }
 0xbcc   :  { %1067 = vrcp.f32 %v522_v62  ;;  %v1039_v62 = vld [vmem:[%s1340_s1] sm:$0xff]  }
 0xbd6   :  { %v1068_v63 = vpop.eup %1067 }
 0xbd7   :  { %v537_v9 = vsub.f32 1.0, %v1068_v63  ;;  %v543_v11 = vmul.f32 %v1068_v63, %v439_v48 }
 0xc2f   :  { %v528_v1 = vpop.permute.xlu0 %527 }
 0xc30   :  { %v530_v2 = vmul.f32 %v1068_v63, %v528_v1  ;;  %v1040_v63 = vld [vmem:[%s1340_s1 + $0x8] sm:$0xff]  }
 0xc32   :  { %532 = vrot.lane.b32.xlu1 %v530_v2, %s1091_s18 }
 0xca4   :  { %v533_v3 = vpop.permute.xlu1 %532 }
 0xca5   :  { %v535_v4 = vadd.f32 %v533_v3, %v517_v57 }
 0xca7   :  { %1069 = vtanh.f32 %v535_v4 }
 0xcb1   :  { %v1070_v8 = vpop.eup %1069 }
 0xcb2   :  { %539 = vrot.lane.b32.xlu0 %v1070_v8, %s1093_s25 }
 0xd24   :  { %v540_v10 = vpop.permute.xlu0 %539 }
 0xd25   :  { %v542_v12 = vmul.f32 %v540_v10, %v537_v9 }
 0xd27   :  { %v544_v13 = vadd.f32 %v543_v11, %v542_v12 }
 0xd29   :  { %v1243_v14 = vpack.c.bf16 %v544_v13, %v544_v13 }
 0xd2b   :  { %563 = vrot.lane.b32.xlu1 %v1243_v14, %s1093_s25 }
 0xd9d   :  { %v564_v15 = vpop.permute.xlu1 %563 }
 0xd9e   :  { %1000 = vmatmul.mubr.msk.bf16.vlgmr.msra.gmra.mrb[8].mxu1 %vm40_vm2, %v564_v15  ;;  %v928_v15 = vld [vmem:[%s1342_s0 + $0xe] sm:$0x3] }
 0xd9f   :  { %1015 = vmatprep.mubr.msk.bf16.mxu1 %vm1090_vm1, %v1089_v0  ;;  %1012 = vmatpush3.bf16.msra.mxu1 %v1039_v62 }
 0xda0   :  { %1013 = vmatprep.subr.bf16.mxu1 %v1089_v0 }
 0xda3   :  { %1014 = vmatpush3.bf16.msra.mxu1 %v1040_v63 }
 0xe71   :  { %v614_v16 = vpop.f32.mrb[8].mxu1 }
 0xe72   :  { %v630_v17 = vadd.f32 %v614_v16, %v1138_v6  ;;  %v1001_v18 = vpop.f32.mrb[9].mxu1  ;;  %v623_v24 = vadd.f32 %v622_v23, %v614_v16  ;;  %v832_v16 = vunpack.c.l.bf16 %v928_v15 }
 0xe73   :  { %v617_v19 = vpop.f32.mrb[10].mxu1 }
 0xe74   :  { %632 = vrot.lane.b32.xlu0 %v630_v17, %s1091_s18  ;;  %v1002_v20 = vpop.f32.mrb[11].mxu1  ;;  %v917_v25 = vmul.f32 -1.442695, %v623_v24  ;;  %v130_v24 = vlaneseq }
 0xe76   :  { %1071 = vpow2.f32 %v917_v25  ;;  %v131_v25 = vshrl.u32 %v130_v24, 7 }
 0xe80   :  { %v1072_v26 = vpop.eup %1071 }
 0xe81   :  { %v627_v27 = vadd.f32 1.0, %v1072_v26 }
 0xe83   :  { %1073 = vrcp.f32 %v627_v27 }
 0xe8d   :  { %v1074_v28 = vpop.eup %1073 }
 0xe8e   :  { %v642_v37 = vsub.f32 1.0, %v1074_v28  ;;  %v648_v39 = vmul.f32 %v1074_v28, %v544_v13 }
 0xee6   :  { %v633_v29 = vpop.permute.xlu0 %632 }
 0xee7   :  { %v635_v30 = vmul.f32 %v1074_v28, %v633_v29 }
 0xee9   :  { %637 = vrot.lane.b32.xlu1 %v635_v30, %s1091_s18 }
 0xf5b   :  { %v638_v31 = vpop.permute.xlu1 %637 }
 0xf5c   :  { %v640_v33 = vadd.f32 %v638_v31, %v622_v23  ;;  %v128_v23 = vunpack.c.l.s4 %v1094_v21 }
 0xf5e   :  { %1075 = vtanh.f32 %v640_v33 }
 0xf68   :  { %v1076_v36 = vpop.eup %1075 }
 0xf69   :  { %644 = vrot.lane.b32.xlu0 %v1076_v36, %s1093_s25 }
 0xfdb   :  { %v645_v38 = vpop.permute.xlu0 %644 }
 0xfdc   :  { %v647_v40 = vmul.f32 %v645_v38, %v642_v37 }
 0xfde   :  { %v649_v41 = vadd.f32 %v648_v39, %v647_v40 }
 0xfe0   :  { %v1264_v42 = vpack.c.bf16 %v649_v41, %v649_v41 }
 0xfe2   :  { %668 = vrot.lane.b32.xlu1 %v1264_v42, %s1093_s25 }
0x1054   :  { %v669_v43 = vpop.permute.xlu1 %668 }
0x1055   :  { %1008 = vmatmul.mubr.msk.bf16.vlgmr.msra.gmra.mrb[12].mxu0 %vm40_vm2, %v669_v43 }
0x1128   :  { %v719_v44 = vpop.f32.mrb[12].mxu0 }
0x1129   :  { %v735_v45 = vadd.f32 %v719_v44, %v1138_v6  ;;  %v1009_v46 = vpop.f32.mrb[13].mxu0  ;;  %v728_v52 = vadd.f32 %v727_v51, %v719_v44 }
0x112a   :  { %v722_v47 = vpop.f32.mrb[14].mxu0 }
0x112b   :  { %737 = vrot.lane.b32.xlu0 %v735_v45, %s1091_s18  ;;  %v1010_v48 = vpop.f32.mrb[15].mxu0  ;;  %v923_v53 = vmul.f32 -1.442695, %v728_v52 }
0x112d   :  { %1077 = vpow2.f32 %v923_v53 }
0x1137   :  { %v1078_v54 = vpop.eup %1077 }
0x1138   :  { %v732_v55 = vadd.f32 1.0, %v1078_v54 }
0x113a   :  { %1079 = vrcp.f32 %v732_v55 }
0x1144   :  { %v1080_v56 = vpop.eup %1079 }
0x1145   :  { %v747_v2 = vsub.f32 1.0, %v1080_v56  ;;  %v753_v4 = vmul.f32 %v1080_v56, %v649_v41 }
0x119d   :  { %v738_v57 = vpop.permute.xlu0 %737 }
0x119e   :  { %v740_v59 = vmul.f32 %v1080_v56, %v738_v57 }
0x11a0   :  { %742 = vrot.lane.b32.xlu1 %v740_v59, %s1091_s18 }
0x1212   :  { %v743_v60 = vpop.permute.xlu1 %742 }
0x1213   :  { %v745_v61 = vadd.f32 %v743_v60, %v727_v51 }
0x1215   :  { %1081 = vtanh.f32 %v745_v61 }
0x121f   :  { %v1082_v1 = vpop.eup %1081 }
0x1220   :  { %749 = vrot.lane.b32.xlu0 %v1082_v1, %s1093_s25 }
0x1292   :  { %v750_v3 = vpop.permute.xlu0 %749 }
0x1293   :  { %v752_v5 = vmul.f32 %v750_v3, %v747_v2 }
0x1295   :  { %v754_v7 = vadd.f32 %v753_v4, %v752_v5 }
0x1297   :  { %v755_v8 = vpack.c.bf16 %v754_v7, %v754_v7 }
0x1299   :  { %773 = vrot.lane.b32.xlu1 %v755_v8, %s1093_s25 }
0x130b   :  { %v774_v9 = vpop.permute.xlu1 %773 }
0x130c   :  { %1016 = vmatmul.mubr.msk.bf16.vlgmr.msra.gmra.mrb[12].mxu1 %vm40_vm2, %v774_v9 }
0x13df   :  { %v824_v10 = vpop.f32.mrb[12].mxu1 }
0x13e0   :  { %v840_v11 = vadd.f32 %v824_v10, %v1138_v6  ;;  %v1017_v12 = vpop.f32.mrb[13].mxu1  ;;  %v833_v17 = vadd.f32 %v832_v16, %v824_v10  ;;  %v129_v6 = vunpack.c.0.s8 %v128_v23 }
0x13e1   :  { %v827_v0 = vpop.f32.mrb[14].mxu1 }
0x13e2   :  { %842 = vrot.lane.b32.xlu0 %v840_v11, %s1091_s18  ;;  %v1018_v13 = vpop.f32.mrb[15].mxu1  ;;  %v929_v18 = vmul.f32 -1.442695, %v833_v17  ;;  %v132_v29 = vsub.s32 %v129_v6, %v131_v25 }
0x13e4   :  { %1083 = vpow2.f32 %v929_v18  ;;  %v133_v30 = vrot.slane %v1155_v32, %v132_v29  ;;  %v343_v31 = vrot.slane %v1199_v22, %v132_v29  ;;  %v553_v33 = vrot.slane %v1243_v14, %v132_v29 }
0x13e5   :  { %v763_v34 = vrot.slane %v755_v8, %v132_v29  ;;  %v238_v39 = vrot.slane %v1177_v58, %v132_v29  ;;  %v448_v40 = vrot.slane %v1221_v49, %v132_v29  ;;  %v658_v41 = vrot.slane %v1264_v42, %v132_v29 }
0x13ee   :  { %v1084_v19 = vpop.eup %1083 }
0x13ef   :  { %v837_v20 = vadd.f32 1.0, %v1084_v19 }
0x13f1   :  { %1085 = vrcp.f32 %v837_v20 }
0x13fb   :  { %v1086_v26 = vpop.eup %1085 }
0x13fc   :  { %v852_v43 = vsub.f32 1.0, %v1086_v26  ;;  %v858_v45 = vmul.f32 %v1086_v26, %v754_v7 }
0x1454   :  { %v843_v27 = vpop.permute.xlu0 %842 }
0x1455   :  { %v845_v28 = vmul.f32 %v1086_v26, %v843_v27 }
0x1457   :  { %847 = vrot.lane.b32.xlu1 %v845_v28, %s1091_s18 }
0x145b   :  { %134 = vrot.lane.b32.xlu1 %v133_v30, %s1093_s25 }
0x145f   :  { %344 = vrot.lane.b32.xlu1 %v343_v31, %s1093_s25 }
0x1463   :  { %554 = vrot.lane.b32.xlu1 %v553_v33, %s1093_s25 }
0x1467   :  { %764 = vrot.lane.b32.xlu1 %v763_v34, %s1093_s25 }
0x14c9   :  { %v848_v35 = vpop.permute.xlu1 %847 }
0x14ca   :  { %v850_v36 = vadd.f32 %v848_v35, %v832_v16 }
0x14cc   :  { %1087 = vtanh.f32 %v850_v36 }
0x14cd   :  { %v135_v37 = vpop.permute.xlu1 %134 }
0x14ce   :  { %138 = vst.msk [vmem:[%s1343_s3] sm:$0x3] %vm137_vm3, %v135_v37 }
0x14d1   :  { %v345_v32 = vpop.permute.xlu1 %344 }
0x14d2   :  { %900 = vst.msk [vmem:[%s1343_s3 + $0x4] sm:$0x3] %vm137_vm3, %v345_v32 }
0x14d5   :  { %v555_v22 = vpop.permute.xlu1 %554 }
0x14d6   :  { %v1088_v14 = vpop.eup %1087  ;;  %912 = vst.msk [vmem:[%s1343_s3 + $0x8] sm:$0x3] %vm137_vm3, %v555_v22 }
0x14d7   :  { %854 = vrot.lane.b32.xlu0 %v1088_v14, %s1093_s25 }
0x14d9   :  { %v765_v38 = vpop.permute.xlu1 %764 }
0x14da   :  { %924 = vst.msk [vmem:[%s1343_s3 + $0xc] sm:$0x3] %vm137_vm3, %v765_v38 }
0x14db   :  { %239 = vrot.lane.b32.xlu0 %v238_v39, %s1093_s25 }
0x14df   :  { %449 = vrot.lane.b32.xlu0 %v448_v40, %s1093_s25 }
0x14e3   :  { %659 = vrot.lane.b32.xlu0 %v658_v41, %s1093_s25 }
0x1549   :  { %v855_v44 = vpop.permute.xlu0 %854 }
0x154a   :  { %v857_v46 = vmul.f32 %v855_v44, %v852_v43 }
0x154c   :  { %v859_v58 = vadd.f32 %v858_v45, %v857_v46 }
0x154d   :  { %v240_v47 = vpop.permute.xlu0 %239 }
0x154e   :  { %v860_v48 = vpack.c.bf16 %v859_v58, %v859_v58  ;;  %894 = vst.msk [vmem:[%s1343_s3 + $0x2] sm:$0x3] %vm137_vm3, %v240_v47  ;;  %875 = vrot.lane.b32.xlu1 %v859_v58, %s1093_s25 }
0x1550   :  { %v868_v49 = vrot.slane %v860_v48, %v132_v29 }
0x1551   :  { %v450_v50 = vpop.permute.xlu0 %449 }
0x1552   :  { %906 = vst.msk [vmem:[%s1343_s3 + $0x6] sm:$0x3] %vm137_vm3, %v450_v50  ;;  %869 = vrot.lane.b32.xlu0 %v868_v49, %s1093_s25 }
0x1555   :  { %v660_v42 = vpop.permute.xlu0 %659 }
0x1556   :  { %918 = vst.msk [vmem:[%s1343_s3 + $0xa] sm:$0x3] %vm137_vm3, %v660_v42 }
0x15c0   :  { %v876_v51 = vpop.permute.xlu1 %875 }
0x15c1   :  { %879 = vst.msk [vmem:[#allocation2] sm:$0xf] %vm19_vm0, %v876_v51 }
0x15c4   :  { %v870_v52 = vpop.permute.xlu0 %869 }
0x15c5   :  { %930 = vst.msk [vmem:[%s1343_s3 + $0xe] sm:$0x3] %vm137_vm3, %v870_v52 }

// kernel: gru_model_forward.7
= control target key start
LH: loop header
LB: loop body
LE: loop exit
PB: predicated region body
PF: predicated region fallthrough
CT: control target
= control target key end

     0   :  { %v1068_v1 = vmov 0.0   ;;  %vm1069_vm0 = vmmov 0   ;;  %vm32_vm1 = vcmask 257024   ;;  %s1070_s30 = smov 64   ;;  %s1294_s0 = inlined_call_operand.vmem [shape: bf16[8,4,96], index: 0, kind: input, shape index: {}]   ;;  %s1295_s1 = inlined_call_operand.vmem [shape: bf16[32,96], index: 1, kind: input, shape index: {}]   ;;  %s1296_s2 = inlined_call_operand.vmem [shape: f32[1,32], index: 2, kind: input, shape index: {}]   ;;  %s1297_s3 = inlined_call_operand.vmem [shape: bf16[32,32], index: 3, kind: input, shape index: {}]   ;;  %s1298_s4 = inlined_call_operand.vmem [shape: f32[1,32], index: 4, kind: input, shape index: {}]   ;;  %s1299_s5 = inlined_call_operand.vmem [shape: bf16[32,3], index: 5, kind: input, shape index: {}]   ;;  %s1300_s6 = inlined_call_operand.vmem [shape: f32[1,3], index: 6, kind: input, shape index: {}]   ;;  %s1301_s7 = inlined_call_operand.hbm [shape: f32[4,3], index: 7, kind: output, shape index: {}]  }
   0x1   :  { %v1117_v0 = vld [vmem:[%s1295_s1] sm:$0xff]   ;;  %904 = vmatprep.subr.bf16.mxu0 %v1068_v1  ;;  %912 = vmatprep.subr.bf16.mxu1 %v1068_v1  ;;  %v1125_v2 = vld [vmem:[%s1295_s1 + $0x8] sm:$0xff]   ;;  %33 = vst.msk [vmem:[#allocation2] sm:$0xf] %vm32_vm1, %v1068_v1 }
   0x2   :  { %905 = vmatpush3.bf16.msra.mxu0 %v1117_v0  ;;  %908 = vmatprep.mubr.msk.bf16.mxu0 %vm1069_vm0, %v1068_v1  ;;  %v844_v3 = vld [vmem:[%s1296_s2] ss:$0 sm:$0xff] }
   0x3   :  { %906 = vmatprep.subr.bf16.mxu0 %v1068_v1  ;;  %111 = vrot.lane.b32.xlu0 %v844_v3, %s1070_s30 }
   0x4   :  { %913 = vmatpush3.bf16.msra.mxu1 %v1117_v0  ;;  %916 = vmatprep.mubr.msk.bf16.mxu1 %vm1069_vm0, %v1068_v1 }
   0x5   :  { %914 = vmatprep.subr.bf16.mxu1 %v1068_v1 }
   0x6   :  { %12 = vsyncpa [#allocation4], 0  ;;  %907 = vmatpush3.bf16.msra.mxu0 %v1125_v2  ;;  %vm53_vm2 = vcmask 261120   ;;  %s1071_s1 = smov 32   ;;  %v97_v12 = vld [vmem:[%s1294_s0] sm:$0x3] }
   0x7   :  { %920 = vmatprep.subr.bf16.mxu0 %v1068_v1  ;;  %v98_v13 = vunpack.c.l.bf16 %v97_v12  ;;  %s1072_s9 = smov 96   ;;  %v846_v37 = vld [vmem:[%s1294_s0 + $0x2] sm:$0x3]  ;;  %v849_v61 = vld [vmem:[%s1294_s0 + $0x4] sm:$0x3]  ;;  %vm824_vm3 = vcmask 19456  }
   0x8   :  { %915 = vmatpush3.bf16.msra.mxu1 %v1125_v2  ;;  %v35_v4 = vld [vmem:[#allocation2] sm:$0xf]  ;;  %v187_v38 = vunpack.c.l.bf16 %v846_v37  ;;  %v264_v62 = vunpack.c.l.bf16 %v849_v61 }
   0x9   :  { %928 = vmatprep.subr.bf16.mxu1 %v1068_v1  ;;  %v36_v5 = vpack.c.bf16 %v35_v4, %v35_v4 }
   0xb   :  { %909 = vmatmul.mubr.msk.bf16.vlgmr.msra.gmra.mrb[0].mxu0 %vm53_vm2, %v36_v5 }
   0xc   :  { %921 = vmatpush3.bf16.msra.mxu0 %v1117_v0  ;;  %924 = vmatprep.mubr.msk.bf16.mxu0 %vm1069_vm0, %v1068_v1 }
   0xd   :  { %922 = vmatprep.subr.bf16.mxu0 %v1068_v1 }
  0x10   :  { %923 = vmatpush3.bf16.msra.mxu0 %v1125_v2 }
  0x11   :  { %936 = vmatprep.subr.bf16.mxu0 %v1068_v1 }
  0x75   :  { %v1151_v6 = vpop.permute.xlu0 %111 }
  0xde   :  { %v91_v7 = vpop.f32.mrb[0].mxu0 }
  0xdf   :  { %v114_v8 = vadd.f32 %v1151_v6, %v91_v7  ;;  %v910_v9 = vpop.f32.mrb[1].mxu0  ;;  %v99_v14 = vadd.f32 %v98_v13, %v91_v7 }
  0xe0   :  { %v94_v10 = vpop.f32.mrb[2].mxu0 }
  0xe1   :  { %116 = vrot.lane.b32.xlu0 %v114_v8, %s1070_s30  ;;  %v911_v11 = vpop.f32.mrb[3].mxu0  ;;  %v843_v15 = vmul.f32 -1.442695, %v99_v14 }
  0xe3   :  { %996 = vpow2.f32 %v843_v15 }
  0xe5   :  { %133 = vrot.lane.b32.xlu0 %v35_v4, %s1071_s1 }
  0xed   :  { %v997_v16 = vpop.eup %996 }
  0xee   :  { %v103_v17 = vadd.f32 1.0, %v997_v16 }
  0xf0   :  { %998 = vrcp.f32 %v103_v17 }
  0xfa   :  { %v999_v18 = vpop.eup %998 }
  0xfb   :  { %v126_v25 = vsub.f32 1.0, %v999_v18 }
 0x153   :  { %v117_v19 = vpop.permute.xlu0 %116 }
 0x154   :  { %v119_v20 = vmul.f32 %v999_v18, %v117_v19 }
 0x156   :  { %121 = vrot.lane.b32.xlu1 %v119_v20, %s1070_s30 }
 0x157   :  { %v134_v24 = vpop.permute.xlu0 %133 }
 0x158   :  { %v136_v27 = vmul.f32 %v999_v18, %v134_v24 }
 0x1c8   :  { %v122_v21 = vpop.permute.xlu1 %121 }
 0x1c9   :  { %v124_v22 = vadd.f32 %v122_v21, %v98_v13 }
 0x1cb   :  { %1000 = vtanh.f32 %v124_v22 }
 0x1d5   :  { %v1001_v23 = vpop.eup %1000 }
 0x1d6   :  { %128 = vrot.lane.b32.xlu1 %v1001_v23, %s1072_s9 }
 0x248   :  { %v129_v26 = vpop.permute.xlu1 %128 }
 0x249   :  { %v131_v28 = vmul.f32 %v129_v26, %v126_v25  ;;  %v852_v25 = vld [vmem:[%s1294_s0 + $0x6] sm:$0x3] }
 0x24a   :  { %v341_v26 = vunpack.c.l.bf16 %v852_v25 }
 0x24b   :  { %v137_v29 = vadd.f32 %v136_v27, %v131_v28 }
 0x24d   :  { %v138_v30 = vpack.c.bf16 %v137_v29, %v137_v29 }
 0x24f   :  { %140 = vrot.lane.b32.xlu1 %v138_v30, %s1072_s9 }
 0x2c1   :  { %v141_v31 = vpop.permute.xlu1 %140 }
 0x2c2   :  { %917 = vmatmul.mubr.msk.bf16.vlgmr.msra.gmra.mrb[0].mxu1 %vm53_vm2, %v141_v31 }
 0x2c3   :  { %929 = vmatpush3.bf16.msra.mxu1 %v1117_v0  ;;  %932 = vmatprep.mubr.msk.bf16.mxu1 %vm1069_vm0, %v1068_v1 }
 0x2c4   :  { %930 = vmatprep.subr.bf16.mxu1 %v1068_v1 }
 0x2c7   :  { %931 = vmatpush3.bf16.msra.mxu1 %v1125_v2 }
 0x2c8   :  { %944 = vmatprep.subr.bf16.mxu1 %v1068_v1 }
 0x395   :  { %v179_v32 = vpop.f32.mrb[0].mxu1 }
 0x396   :  { %v195_v33 = vadd.f32 %v179_v32, %v1151_v6  ;;  %v918_v34 = vpop.f32.mrb[1].mxu1  ;;  %v188_v39 = vadd.f32 %v187_v38, %v179_v32 }
 0x397   :  { %v182_v35 = vpop.f32.mrb[2].mxu1 }
 0x398   :  { %197 = vrot.lane.b32.xlu0 %v195_v33, %s1070_s30  ;;  %v919_v36 = vpop.f32.mrb[3].mxu1  ;;  %v847_v40 = vmul.f32 -1.442695, %v188_v39 }
 0x39a   :  { %1002 = vpow2.f32 %v847_v40 }
 0x3a4   :  { %v1003_v41 = vpop.eup %1002 }
 0x3a5   :  { %v192_v42 = vadd.f32 1.0, %v1003_v41 }
 0x3a7   :  { %1004 = vrcp.f32 %v192_v42 }
 0x3b1   :  { %v1005_v43 = vpop.eup %1004 }
 0x3b2   :  { %v207_v49 = vsub.f32 1.0, %v1005_v43  ;;  %v213_v51 = vmul.f32 %v1005_v43, %v137_v29 }
 0x40a   :  { %v198_v44 = vpop.permute.xlu0 %197 }
 0x40b   :  { %v200_v45 = vmul.f32 %v1005_v43, %v198_v44 }
 0x40d   :  { %202 = vrot.lane.b32.xlu1 %v200_v45, %s1070_s30 }
 0x47f   :  { %v203_v46 = vpop.permute.xlu1 %202 }
 0x480   :  { %v205_v47 = vadd.f32 %v203_v46, %v187_v38 }
 0x482   :  { %1006 = vtanh.f32 %v205_v47 }
 0x48c   :  { %v1007_v48 = vpop.eup %1006 }
 0x48d   :  { %209 = vrot.lane.b32.xlu0 %v1007_v48, %s1072_s9 }
 0x4ff   :  { %v210_v50 = vpop.permute.xlu0 %209 }
 0x500   :  { %v212_v52 = vmul.f32 %v210_v50, %v207_v49  ;;  %v855_v49 = vld [vmem:[%s1294_s0 + $0x8] sm:$0x3] }
 0x501   :  { %v418_v50 = vunpack.c.l.bf16 %v855_v49 }
 0x502   :  { %v214_v53 = vadd.f32 %v213_v51, %v212_v52 }
 0x504   :  { %v215_v54 = vpack.c.bf16 %v214_v53, %v214_v53 }
 0x506   :  { %217 = vrot.lane.b32.xlu1 %v215_v54, %s1072_s9 }
 0x578   :  { %v218_v55 = vpop.permute.xlu1 %217 }
 0x579   :  { %925 = vmatmul.mubr.msk.bf16.vlgmr.msra.gmra.mrb[4].mxu0 %vm53_vm2, %v218_v55 }
 0x57a   :  { %937 = vmatpush3.bf16.msra.mxu0 %v1117_v0  ;;  %940 = vmatprep.mubr.msk.bf16.mxu0 %vm1069_vm0, %v1068_v1 }
 0x57b   :  { %938 = vmatprep.subr.bf16.mxu0 %v1068_v1 }
 0x57e   :  { %939 = vmatpush3.bf16.msra.mxu0 %v1125_v2 }
 0x57f   :  { %952 = vmatprep.subr.bf16.mxu0 %v1068_v1 }
 0x64c   :  { %v256_v56 = vpop.f32.mrb[4].mxu0 }
 0x64d   :  { %v272_v57 = vadd.f32 %v256_v56, %v1151_v6  ;;  %v926_v58 = vpop.f32.mrb[5].mxu0  ;;  %v265_v63 = vadd.f32 %v264_v62, %v256_v56 }
 0x64e   :  { %v259_v59 = vpop.f32.mrb[6].mxu0 }
 0x64f   :  { %274 = vrot.lane.b32.xlu0 %v272_v57, %s1070_s30  ;;  %v927_v60 = vpop.f32.mrb[7].mxu0  ;;  %v850_v3 = vmul.f32 -1.442695, %v265_v63 }
 0x651   :  { %1008 = vpow2.f32 %v850_v3 }
 0x65b   :  { %v1009_v4 = vpop.eup %1008 }
 0x65c   :  { %v269_v5 = vadd.f32 1.0, %v1009_v4 }
 0x65e   :  { %1010 = vrcp.f32 %v269_v5 }
 0x668   :  { %v1011_v7 = vpop.eup %1010 }
 0x669   :  { %v284_v13 = vsub.f32 1.0, %v1011_v7  ;;  %v290_v15 = vmul.f32 %v1011_v7, %v214_v53 }
 0x6c1   :  { %v275_v8 = vpop.permute.xlu0 %274 }
 0x6c2   :  { %v277_v9 = vmul.f32 %v1011_v7, %v275_v8 }
 0x6c4   :  { %279 = vrot.lane.b32.xlu1 %v277_v9, %s1070_s30 }
 0x736   :  { %v280_v10 = vpop.permute.xlu1 %279 }
 0x737   :  { %v282_v11 = vadd.f32 %v280_v10, %v264_v62 }
 0x739   :  { %1012 = vtanh.f32 %v282_v11 }
 0x743   :  { %v1013_v12 = vpop.eup %1012 }
 0x744   :  { %286 = vrot.lane.b32.xlu0 %v1013_v12, %s1072_s9 }
 0x7b6   :  { %v287_v14 = vpop.permute.xlu0 %286 }
 0x7b7   :  { %v289_v16 = vmul.f32 %v287_v14, %v284_v13 }
 0x7b9   :  { %v291_v17 = vadd.f32 %v290_v15, %v289_v16 }
 0x7bb   :  { %v292_v18 = vpack.c.bf16 %v291_v17, %v291_v17 }
 0x7bd   :  { %294 = vrot.lane.b32.xlu1 %v292_v18, %s1072_s9 }
 0x82f   :  { %v295_v19 = vpop.permute.xlu1 %294 }
 0x830   :  { %933 = vmatmul.mubr.msk.bf16.vlgmr.msra.gmra.mrb[4].mxu1 %vm53_vm2, %v295_v19 }
 0x831   :  { %945 = vmatpush3.bf16.msra.mxu1 %v1117_v0  ;;  %948 = vmatprep.mubr.msk.bf16.mxu1 %vm1069_vm0, %v1068_v1 }
 0x832   :  { %946 = vmatprep.subr.bf16.mxu1 %v1068_v1 }
 0x835   :  { %947 = vmatpush3.bf16.msra.mxu1 %v1125_v2 }
 0x836   :  { %960 = vmatprep.subr.bf16.mxu1 %v1068_v1 }
 0x903   :  { %v333_v20 = vpop.f32.mrb[4].mxu1 }
 0x904   :  { %v349_v21 = vadd.f32 %v333_v20, %v1151_v6  ;;  %v934_v22 = vpop.f32.mrb[5].mxu1  ;;  %v342_v27 = vadd.f32 %v341_v26, %v333_v20 }
 0x905   :  { %v336_v23 = vpop.f32.mrb[6].mxu1 }
 0x906   :  { %351 = vrot.lane.b32.xlu0 %v349_v21, %s1070_s30  ;;  %v935_v24 = vpop.f32.mrb[7].mxu1  ;;  %v853_v28 = vmul.f32 -1.442695, %v342_v27 }
 0x908   :  { %1014 = vpow2.f32 %v853_v28 }
 0x912   :  { %v1015_v29 = vpop.eup %1014 }
 0x913   :  { %v346_v30 = vadd.f32 1.0, %v1015_v29 }
 0x915   :  { %1016 = vrcp.f32 %v346_v30 }
 0x91f   :  { %v1017_v31 = vpop.eup %1016 }
 0x920   :  { %v361_v37 = vsub.f32 1.0, %v1017_v31  ;;  %v367_v39 = vmul.f32 %v1017_v31, %v291_v17 }
 0x978   :  { %v352_v32 = vpop.permute.xlu0 %351 }
 0x979   :  { %v354_v33 = vmul.f32 %v1017_v31, %v352_v32 }
 0x97b   :  { %356 = vrot.lane.b32.xlu1 %v354_v33, %s1070_s30 }
 0x9ed   :  { %v357_v34 = vpop.permute.xlu1 %356 }
 0x9ee   :  { %v359_v35 = vadd.f32 %v357_v34, %v341_v26 }
 0x9f0   :  { %1018 = vtanh.f32 %v359_v35  ;;  %v861_v35 = vld [vmem:[%s1294_s0 + $0xc] sm:$0x3] }
 0x9fa   :  { %v1019_v36 = vpop.eup %1018 }
 0x9fb   :  { %363 = vrot.lane.b32.xlu0 %v1019_v36, %s1072_s9  ;;  %v572_v36 = vunpack.c.l.bf16 %v861_v35 }
 0xa6d   :  { %v364_v38 = vpop.permute.xlu0 %363 }
 0xa6e   :  { %v366_v40 = vmul.f32 %v364_v38, %v361_v37 }
 0xa70   :  { %v368_v41 = vadd.f32 %v367_v39, %v366_v40 }
 0xa72   :  { %v369_v42 = vpack.c.bf16 %v368_v41, %v368_v41 }
 0xa74   :  { %371 = vrot.lane.b32.xlu1 %v369_v42, %s1072_s9 }
 0xae6   :  { %v372_v43 = vpop.permute.xlu1 %371 }
 0xae7   :  { %941 = vmatmul.mubr.msk.bf16.vlgmr.msra.gmra.mrb[8].mxu0 %vm53_vm2, %v372_v43 }
 0xae8   :  { %953 = vmatpush3.bf16.msra.mxu0 %v1117_v0  ;;  %956 = vmatprep.mubr.msk.bf16.mxu0 %vm1069_vm0, %v1068_v1 }
 0xae9   :  { %954 = vmatprep.subr.bf16.mxu0 %v1068_v1 }
 0xaec   :  { %955 = vmatpush3.bf16.msra.mxu0 %v1125_v2 }
 0xaed   :  { %968 = vmatprep.subr.bf16.mxu0 %v1068_v1 }
 0xbba   :  { %v410_v44 = vpop.f32.mrb[8].mxu0 }
 0xbbb   :  { %v426_v45 = vadd.f32 %v410_v44, %v1151_v6  ;;  %v942_v46 = vpop.f32.mrb[9].mxu0  ;;  %v419_v51 = vadd.f32 %v418_v50, %v410_v44 }
 0xbbc   :  { %v413_v47 = vpop.f32.mrb[10].mxu0 }
 0xbbd   :  { %428 = vrot.lane.b32.xlu0 %v426_v45, %s1070_s30  ;;  %v943_v48 = vpop.f32.mrb[11].mxu0  ;;  %v856_v52 = vmul.f32 -1.442695, %v419_v51 }
 0xbbf   :  { %1020 = vpow2.f32 %v856_v52 }
 0xbc9   :  { %v1021_v53 = vpop.eup %1020 }
 0xbca   :  { %v423_v54 = vadd.f32 1.0, %v1021_v53 }
 0xbcc   :  { %1022 = vrcp.f32 %v423_v54 }
 0xbd6   :  { %v1023_v55 = vpop.eup %1022 }
 0xbd7   :  { %v438_v61 = vsub.f32 1.0, %v1023_v55  ;;  %v444_v63 = vmul.f32 %v1023_v55, %v368_v41 }
 0xc2f   :  { %v429_v56 = vpop.permute.xlu0 %428 }
 0xc30   :  { %v431_v57 = vmul.f32 %v1023_v55, %v429_v56 }
 0xc32   :  { %433 = vrot.lane.b32.xlu1 %v431_v57, %s1070_s30 }
 0xca4   :  { %v434_v58 = vpop.permute.xlu1 %433 }
 0xca5   :  { %v436_v59 = vadd.f32 %v434_v58, %v418_v50 }
 0xca7   :  { %1024 = vtanh.f32 %v436_v59  ;;  %v864_v59 = vld [vmem:[%s1294_s0 + $0xe] sm:$0x3] }
 0xcb1   :  { %v1025_v60 = vpop.eup %1024 }
 0xcb2   :  { %440 = vrot.lane.b32.xlu0 %v1025_v60, %s1072_s9  ;;  %v649_v60 = vunpack.c.l.bf16 %v864_v59 }
 0xd24   :  { %v441_v62 = vpop.permute.xlu0 %440 }
 0xd25   :  { %v443_v3 = vmul.f32 %v441_v62, %v438_v61 }
 0xd27   :  { %v445_v4 = vadd.f32 %v444_v63, %v443_v3 }
 0xd29   :  { %v446_v5 = vpack.c.bf16 %v445_v4, %v445_v4 }
 0xd2b   :  { %448 = vrot.lane.b32.xlu1 %v446_v5, %s1072_s9 }
 0xd9d   :  { %v449_v7 = vpop.permute.xlu1 %448 }
 0xd9e   :  { %949 = vmatmul.mubr.msk.bf16.vlgmr.msra.gmra.mrb[8].mxu1 %vm53_vm2, %v449_v7 }
 0xd9f   :  { %961 = vmatpush3.bf16.msra.mxu1 %v1117_v0  ;;  %964 = vmatprep.mubr.msk.bf16.mxu1 %vm1069_vm0, %v1068_v1  ;;  %v858_v0 = vld [vmem:[%s1294_s0 + $0xa] sm:$0x3] }
 0xda0   :  { %962 = vmatprep.subr.bf16.mxu1 %v1068_v1  ;;  %v495_v13 = vunpack.c.l.bf16 %v858_v0 }
 0xda3   :  { %963 = vmatpush3.bf16.msra.mxu1 %v1125_v2 }
 0xda4   :  { %976 = vmatprep.subr.bf16.mxu1 %v1068_v1 }
 0xe71   :  { %v487_v8 = vpop.f32.mrb[8].mxu1 }
 0xe72   :  { %v503_v9 = vadd.f32 %v487_v8, %v1151_v6  ;;  %v950_v10 = vpop.f32.mrb[9].mxu1  ;;  %v496_v14 = vadd.f32 %v495_v13, %v487_v8 }
 0xe73   :  { %v490_v11 = vpop.f32.mrb[10].mxu1  ;;  %v993_v10 = vld [vmem:[%s1297_s3 + $0x8] sm:$0xff]  }
 0xe74   :  { %505 = vrot.lane.b32.xlu0 %v503_v9, %s1070_s30  ;;  %v951_v12 = vpop.f32.mrb[11].mxu1  ;;  %v859_v15 = vmul.f32 -1.442695, %v496_v14  ;;  %v992_v9 = vld [vmem:[%s1297_s3] sm:$0xff]  }
 0xe75   :  { %v994_v12 = vld [vmem:[%s1299_s5] sm:$0xff]  }
 0xe76   :  { %1026 = vpow2.f32 %v859_v15 }
 0xe80   :  { %v1027_v16 = vpop.eup %1026 }
 0xe81   :  { %v500_v2 = vadd.f32 1.0, %v1027_v16 }
 0xe83   :  { %1028 = vrcp.f32 %v500_v2 }
 0xe8d   :  { %v1029_v17 = vpop.eup %1028 }
 0xe8e   :  { %v515_v23 = vsub.f32 1.0, %v1029_v17  ;;  %v521_v25 = vmul.f32 %v1029_v17, %v445_v4 }
 0xee6   :  { %v506_v18 = vpop.permute.xlu0 %505 }
 0xee7   :  { %v508_v19 = vmul.f32 %v1029_v17, %v506_v18 }
 0xee9   :  { %510 = vrot.lane.b32.xlu1 %v508_v19, %s1070_s30  ;;  %v866_v19 = vld [vmem:[%s1298_s4] ss:$0 sm:$0xff] }
 0xf5b   :  { %v511_v20 = vpop.permute.xlu1 %510 }
 0xf5c   :  { %v513_v21 = vadd.f32 %v511_v20, %v495_v13 }
 0xf5e   :  { %1030 = vtanh.f32 %v513_v21 }
 0xf68   :  { %v1031_v22 = vpop.eup %1030 }
 0xf69   :  { %517 = vrot.lane.b32.xlu0 %v1031_v22, %s1072_s9 }
 0xfdb   :  { %v518_v24 = vpop.permute.xlu0 %517 }
 0xfdc   :  { %v520_v26 = vmul.f32 %v518_v24, %v515_v23 }
 0xfde   :  { %v522_v27 = vadd.f32 %v521_v25, %v520_v26 }
 0xfe0   :  { %v523_v28 = vpack.c.bf16 %v522_v27, %v522_v27 }
 0xfe2   :  { %525 = vrot.lane.b32.xlu1 %v523_v28, %s1072_s9 }
0x1054   :  { %v526_v29 = vpop.permute.xlu1 %525 }
0x1055   :  { %957 = vmatmul.mubr.msk.bf16.vlgmr.msra.gmra.mrb[12].mxu0 %vm53_vm2, %v526_v29 }
0x1056   :  { %972 = vmatprep.mubr.msk.bf16.mxu0 %vm1069_vm0, %v1068_v1  ;;  %969 = vmatpush3.bf16.msra.mxu0 %v992_v9 }
0x1057   :  { %970 = vmatprep.subr.bf16.mxu0 %v1068_v1 }
0x105a   :  { %971 = vmatpush3.bf16.msra.mxu0 %v993_v10 }
0x1128   :  { %v564_v30 = vpop.f32.mrb[12].mxu0 }
0x1129   :  { %v580_v31 = vadd.f32 %v564_v30, %v1151_v6  ;;  %v958_v32 = vpop.f32.mrb[13].mxu0  ;;  %v573_v37 = vadd.f32 %v572_v36, %v564_v30 }
0x112a   :  { %v567_v33 = vpop.f32.mrb[14].mxu0 }
0x112b   :  { %582 = vrot.lane.b32.xlu0 %v580_v31, %s1070_s30  ;;  %v959_v34 = vpop.f32.mrb[15].mxu0  ;;  %v862_v38 = vmul.f32 -1.442695, %v573_v37 }
0x112d   :  { %1032 = vpow2.f32 %v862_v38 }
0x1137   :  { %v1033_v39 = vpop.eup %1032 }
0x1138   :  { %v577_v40 = vadd.f32 1.0, %v1033_v39 }
0x113a   :  { %1034 = vrcp.f32 %v577_v40 }
0x1144   :  { %v1035_v41 = vpop.eup %1034 }
0x1145   :  { %v592_v47 = vsub.f32 1.0, %v1035_v41  ;;  %v598_v49 = vmul.f32 %v1035_v41, %v522_v27  ;;  %v870_v27 = vld [vmem:[%s1300_s6] ss:$0 sm:$0xff] }
0x119d   :  { %v583_v42 = vpop.permute.xlu0 %582 }
0x119e   :  { %v585_v43 = vmul.f32 %v1035_v41, %v583_v42 }
0x11a0   :  { %587 = vrot.lane.b32.xlu1 %v585_v43, %s1070_s30 }
0x1212   :  { %v588_v44 = vpop.permute.xlu1 %587 }
0x1213   :  { %v590_v45 = vadd.f32 %v588_v44, %v572_v36 }
0x1215   :  { %1036 = vtanh.f32 %v590_v45 }
0x121f   :  { %v1037_v46 = vpop.eup %1036 }
0x1220   :  { %594 = vrot.lane.b32.xlu0 %v1037_v46, %s1072_s9 }
0x1292   :  { %v595_v48 = vpop.permute.xlu0 %594 }
0x1293   :  { %v597_v50 = vmul.f32 %v595_v48, %v592_v47 }
0x1295   :  { %v599_v51 = vadd.f32 %v598_v49, %v597_v50 }
0x1297   :  { %v600_v52 = vpack.c.bf16 %v599_v51, %v599_v51 }
0x1299   :  { %602 = vrot.lane.b32.xlu1 %v600_v52, %s1072_s9 }
0x130b   :  { %v603_v53 = vpop.permute.xlu1 %602 }
0x130c   :  { %965 = vmatmul.mubr.msk.bf16.vlgmr.msra.gmra.mrb[12].mxu1 %vm53_vm2, %v603_v53 }
0x130d   :  { %980 = vmatprep.mubr.msk.bf16.mxu1 %vm1069_vm0, %v1068_v1  ;;  %977 = vmatpush3.bf16.msra.mxu1 %v994_v12 }
0x130e   :  { %978 = vmatprep.subr.bf16.mxu1 %v1068_v1  ;;  %v995_v1 = vld [vmem:[%s1299_s5 + $0x8] sm:$0xff]  }
0x1311   :  { %979 = vmatpush3.bf16.msra.mxu1 %v995_v1 }
0x13df   :  { %v641_v54 = vpop.f32.mrb[12].mxu1 }
0x13e0   :  { %v657_v55 = vadd.f32 %v641_v54, %v1151_v6  ;;  %v966_v56 = vpop.f32.mrb[13].mxu1  ;;  %v650_v61 = vadd.f32 %v649_v60, %v641_v54 }
0x13e1   :  { %v644_v57 = vpop.f32.mrb[14].mxu1 }
0x13e2   :  { %659 = vrot.lane.b32.xlu0 %v657_v55, %s1070_s30  ;;  %v967_v58 = vpop.f32.mrb[15].mxu1  ;;  %v865_v62 = vmul.f32 -1.442695, %v650_v61 }
0x13e4   :  { %1038 = vpow2.f32 %v865_v62 }
0x13ee   :  { %v1039_v63 = vpop.eup %1038 }
0x13ef   :  { %v654_v3 = vadd.f32 1.0, %v1039_v63 }
0x13f1   :  { %1040 = vrcp.f32 %v654_v3 }
0x13fb   :  { %v1041_v4 = vpop.eup %1040 }
0x13fc   :  { %v669_v0 = vsub.f32 1.0, %v1041_v4  ;;  %v675_v14 = vmul.f32 %v1041_v4, %v599_v51 }
0x1454   :  { %v660_v5 = vpop.permute.xlu0 %659 }
0x1455   :  { %v662_v7 = vmul.f32 %v1041_v4, %v660_v5 }
0x1457   :  { %664 = vrot.lane.b32.xlu1 %v662_v7, %s1070_s30 }
0x14c9   :  { %v665_v6 = vpop.permute.xlu1 %664 }
0x14ca   :  { %v667_v8 = vadd.f32 %v665_v6, %v649_v60 }
0x14cc   :  { %1042 = vtanh.f32 %v667_v8 }
0x14d6   :  { %v1043_v11 = vpop.eup %1042 }
0x14d7   :  { %671 = vrot.lane.b32.xlu0 %v1043_v11, %s1072_s9 }
0x1549   :  { %v672_v13 = vpop.permute.xlu0 %671 }
0x154a   :  { %v674_v15 = vmul.f32 %v672_v13, %v669_v0 }
0x154c   :  { %v676_v16 = vadd.f32 %v675_v14, %v674_v15 }
0x154e   :  { %678 = vrot.lane.b32.xlu0 %v676_v16, %s1072_s9  ;;  %v686_v2 = vpack.c.bf16 %v676_v16, %v676_v16 }
0x1550   :  { %699 = vrot.lane.b32.xlu1 %v686_v2, %s1072_s9  ;;  %s1073_s9 = smov [#allocation3]  }
0x1551   :  { %s832_s5 = sshll.u32 %s1073_s9, 4  ;;  %s833_s5 = int_to_ptr.vmem [resolvable:$true] %s832_s5 }
0x1552   :  { %s1044_s4 = scalar_lea.vmem %s833_s5, 64  ;;  %p1049_p1 = scmp.lt.s32.totalorder %s833_s5, %s833_s5 }
0x1553   :  { %p1045_p0 = scmp.ne.s32.totalorder %s833_s5, %s1044_s4  ;;  %p1050_p2 = scmp.lt.s32.totalorder %s1044_s4, %s1044_s4 }
0x1555   :  { %p1051_p3 = por %p1050_p2, %p1049_p1 }
0x1557   :  { %p1052_p4 = pnand %p1051_p3, %p1045_p0 }
0x15c0   :  { %v679_v17 = vpop.permute.xlu0 %678 }
0x15c1   :  { %682 = vst.msk [vmem:[#allocation2] sm:$0xf] %vm32_vm1, %v679_v17 }
0x15c2   :  { %v700_v18 = vpop.permute.xlu1 %699 }
0x15c3   :  { %973 = vmatmul.mubr.msk.bf16.vlgmr.msra.gmra.mrb[16].mxu0 %vm53_vm2, %v700_v18 }
0x1696   :  { %v750_v20 = vpop.f32.mrb[16].mxu0 }
0x1697   :  { %v751_v21 = vadd.f32 %v866_v19, %v750_v20  ;;  %v974_v22 = vpop.f32.mrb[17].mxu0 }
0x1698   :  { %v753_v23 = vpop.f32.mrb[18].mxu0 }
0x1699   :  { %v756_v24 = vmax.f32 %v751_v21, 0.0  ;;  %v975_v25 = vpop.f32.mrb[19].mxu0 }
0x169b   :  { %v757_v26 = vpack.c.bf16 %v756_v24, %v756_v24 }
0x169d   :  { %981 = vmatmul.mubr.msk.bf16.vlgmr.msra.gmra.mrb[16].mxu1 %vm53_vm2, %v757_v26 }
0x1770   :  { %v818_v28 = vpop.f32.mrb[16].mxu1 }
0x1771   :  { %v819_v29 = vadd.f32 %v870_v27, %v818_v28  ;;  %v982_v30 = vpop.f32.mrb[17].mxu1 }
0x1772   :  { %v821_v31 = vpop.f32.mrb[18].mxu1 }
0x1773   :  { %v983_v32 = vpop.f32.mrb[19].mxu1  ;;  %825 = vst.msk [vmem:[#allocation3] sm:$0xf] %vm824_vm3, %v819_v29 }
0x1774   :  { %1055 = shalt.err (!%p1052_p4)
}
0x1775   :  { %s1056_s6 = scalar_lea.hbm %s1301_s7, 64 }
0x1776   :  { %p1057_p5 = scmp.ne.s32.totalorder %s1301_s7, %s1056_s6  ;;  %p1060_p6 = scmp.lt.u32.totalorder %s1056_s6, %s1301_s7 }
0x1778   :  { %p1062_p7 = pnand %p1060_p6, %p1057_p5 }
0x177a   :  { %1065 = shalt.err (!%p1062_p7)
}
0x177b   :  { %835 = dma.vmem_to_hbm [thread:$0]  %s833_s5, 64, %s1301_s7, [#allocation4]  }
0x177c   :  { %1066 = dma.done.wait [#allocation4], 64  }
0x177d   :  { %1067 = vsyncadd [#allocation4], 4294967232 }
0x177e   :  { %839 = vsyncpa [#allocation4], 1 }

</bundles_post_ra>
